<compile_context>
chip_gen: v6e
topology: v6e:2x2x1
jax: 0.10.0
libtpu: 0.0.40
codegen_flags: <defaults>
</compile_context>

<pallas_src>
import functools
import math

import jax
import jax.numpy as jnp
from jax.experimental import pallas as pl
from jax.experimental.pallas import tpu as pltpu


def _fused_block_kernel(x_ref, m_ref, w1_ref, b1_ref, w2_ref, b2_ref, o_ref,
                        zf1_ref, zf2_ref, *, W, pad):
    """One batch element: conv3x3+LeakyReLU -> conv3x3+LeakyReLU, all in VMEM.

    Channels live on sublanes, flattened H*W on lanes (NCHW native).

    x_ref  : (1, Cin, H*W)     flattened input tile
    m_ref  : (2, H*W)          f32 {0,1} column masks: [0]: w != 0, [1]: w != W-1
    w1_ref : (Cout, 9*Cin)     layer-1 weights, rows ordered (kh, kw, cin)
    b1_ref : (Cout, 1)
    w2_ref : (Cout, 9*Cout)    layer-2 weights
    b2_ref : (Cout, 1)
    o_ref  : (1, Cout, H*W)
    zf*_ref: (C, 2*pad + H*W)  flat activation scratch; interior at
                               [pad, pad+H*W), (W+1)-wide zero halo around it.
    """
    _, Cout, HW = o_ref.shape
    Cin = x_ref.shape[1]
    halo = W + 1

    masks = m_ref[...]
    mask_l = masks[0:1, :]      # kills columns with w == 0   (used for kw == 0)
    mask_r = masks[1:2, :]      # kills columns with w == W-1 (used for kw == 2)

    def conv3x3_lrelu(zf_ref, wf, b):
        # Band (kh, kw) of the im2col is the flat activation shifted by
        # (kh-1)*W + (kw-1); out-of-image / row-crossing reads either land in
        # the zero halo or are killed by the w-masks.
        bands = []
        for kh in range(3):
            for kw in range(3):
                start = pad + (kh - 1) * W + (kw - 1)      # static offset
                band = zf_ref[:, pl.ds(start, HW)]          # (C, H*W)
                if kw == 0:
                    band = band * mask_l
                elif kw == 2:
                    band = band * mask_r
                bands.append(band)
        im2col = jnp.concatenate(bands, axis=0)              # (9*C, H*W)
        acc = jnp.dot(wf, im2col,
                      preferred_element_type=jnp.float32)    # (Cout, H*W)
        acc = acc + b                                        # bias (Cout, 1)
        return jnp.maximum(acc, 0.2 * acc)                   # LeakyReLU(0.2)

    # ---- layer 1 ----
    # Re-zero only the halo (cheap, core-safe); the interior is fully
    # overwritten every grid step, so no full-scratch zeroing is needed.
    z_in = jnp.zeros((Cin, halo), jnp.float32)
    zf1_ref[:, pl.ds(pad - halo, halo)] = z_in
    zf1_ref[:, pl.ds(pad + HW, halo)] = z_in
    zf1_ref[:, pl.ds(pad, HW)] = x_ref[0].astype(jnp.float32)
    h = conv3x3_lrelu(zf1_ref, w1_ref[...], b1_ref[...])

    # ---- layer 2: intermediate stays in VMEM (no HBM round trip) ----
    z_mid = jnp.zeros((Cout, halo), jnp.float32)
    zf2_ref[:, pl.ds(pad - halo, halo)] = z_mid
    zf2_ref[:, pl.ds(pad + HW, halo)] = z_mid
    zf2_ref[:, pl.ds(pad, HW)] = h
    y = conv3x3_lrelu(zf2_ref, w2_ref[...], b2_ref[...])

    o_ref[...] = y[None].astype(o_ref.dtype)


def single_block_forward(x_nchw, params):
    """Pallas equivalent of single_block.forward.  x_nchw: (N, Cin, H, W).

    params: (w1, b1, w2, b2) with w*: (Cout, Cin, 3, 3) (PyTorch OIHW layout)
    and b*: (Cout,).  Returns (N, Cout, H, W).
    """
    w1, b1, w2, b2 = params
    N, Cin, H, W = x_nchw.shape
    Cout = w1.shape[0]
    HW = H * W
    pad = -(-(W + 1) // 128) * 128        # lane-aligned interior offset >= W+1
    scratch_w = 2 * pad + HW

    # Layout plumbing (tiny, outside the kernel): flatten spatial dims, weights
    # to (Cout, 9*Cin) with rows ordered (kh, kw, cin), bias to (Cout, 1).
    x_flat = x_nchw.reshape(N, Cin, HW)
    w1f = jnp.transpose(w1, (0, 2, 3, 1)).reshape(Cout, 9 * Cin)
    w2f = jnp.transpose(w2, (0, 2, 3, 1)).reshape(Cout, 9 * Cout)
    b1f = b1.reshape(Cout, 1)
    b2f = b2.reshape(Cout, 1)

    col = jnp.arange(HW, dtype=jnp.int32) % W
    masks = jnp.stack([col != 0, col != W - 1]).astype(jnp.float32)   # (2, HW)

    kernel = functools.partial(_fused_block_kernel, W=W, pad=pad)

    out_flat = pl.pallas_call(
        kernel,
        out_shape=jax.ShapeDtypeStruct((N, Cout, HW), x_nchw.dtype),
        grid_spec=pltpu.PrefetchScalarGridSpec(
            num_scalar_prefetch=0,
            grid=(N,),
            in_specs=[
                pl.BlockSpec((1, Cin, HW), lambda n: (n, 0, 0)),
                pl.BlockSpec((2, HW), lambda n: (0, 0)),
                pl.BlockSpec((Cout, 9 * Cin), lambda n: (0, 0)),
                pl.BlockSpec((Cout, 1), lambda n: (0, 0)),
                pl.BlockSpec((Cout, 9 * Cout), lambda n: (0, 0)),
                pl.BlockSpec((Cout, 1), lambda n: (0, 0)),
            ],
            out_specs=pl.BlockSpec((1, Cout, HW), lambda n: (n, 0, 0)),
            scratch_shapes=[
                pltpu.VMEM((Cin, scratch_w), jnp.float32),
                pltpu.VMEM((Cout, scratch_w), jnp.float32),
            ],
        ),
        compiler_params=pltpu.CompilerParams(
            dimension_semantics=("parallel",)),
    )(x_flat, masks, w1f, b1f, w2f, b2f)

    return out_flat.reshape(N, Cout, H, W)


def init_params(key, in_channel=32, out_channel=32):
    """Deterministic kaiming-uniform-style init, PyTorch (O, I, kh, kw) layout."""
    k1, k2, k3, k4 = jax.random.split(key, 4)
    bound1 = 1.0 / math.sqrt(in_channel * 9)
    bound2 = 1.0 / math.sqrt(out_channel * 9)
    w1 = jax.random.uniform(k1, (out_channel, in_channel, 3, 3), jnp.float32,
                            -bound1, bound1)
    b1 = jax.random.uniform(k2, (out_channel,), jnp.float32, -bound1, bound1)
    w2 = jax.random.uniform(k3, (out_channel, out_channel, 3, 3), jnp.float32,
                            -bound2, bound2)
    b2 = jax.random.uniform(k4, (out_channel,), jnp.float32, -bound2, bound2)
    return w1, b1, w2, b2


def _reference_forward(x_nchw, params):
    """Pure-JAX reference (lax.conv) for the correctness check."""
    w1, b1, w2, b2 = params

    def conv(x, w, b):
        y = jax.lax.conv_general_dilated(
            x, w, window_strides=(1, 1), padding="SAME",
            dimension_numbers=("NCHW", "OIHW", "NCHW"))
        y = y + b[None, :, None, None]
        return jnp.where(y > 0, y, 0.2 * y)

    return conv(conv(x_nchw, w1, b1), w2, b2)


if __name__ == "__main__":
    key = jax.random.PRNGKey(0)
    kx, kp = jax.random.split(key)

    N, C, H, Wd = 2, 32, 16, 16          # module default: in_channel=out_channel=32
    x = jax.random.normal(kx, (N, C, H, Wd), jnp.float32)
    params = init_params(kp, in_channel=C, out_channel=C)

    out = single_block_forward(x, params)
    out = jax.block_until_ready(out)

    ref = _reference_forward(x, params)
    assert out.shape == (N, C, H, Wd), out.shape
    assert jnp.allclose(out, ref, atol=1e-3, rtol=1e-3), \
        float(jnp.max(jnp.abs(out - ref)))

    print("KERNEL_OK")
</pallas_src>

<mosaic_0001>
module attributes {stable_mosaic.version = 11 : i64} {
  func.func @_fused_block_kernel(%arg0: i32, %arg1: memref<1x32x256xf32, #tpu.memory_space<vmem>>, %arg2: memref<2x256xf32, #tpu.memory_space<vmem>>, %arg3: memref<32x288xf32, #tpu.memory_space<vmem>>, %arg4: memref<32x1xf32, #tpu.memory_space<vmem>>, %arg5: memref<32x288xf32, #tpu.memory_space<vmem>>, %arg6: memref<32x1xf32, #tpu.memory_space<vmem>>, %arg7: memref<1x32x256xf32, #tpu.memory_space<vmem>>, %arg8: memref<32x512xf32, #tpu.memory_space<vmem>>, %arg9: memref<32x512xf32, #tpu.memory_space<vmem>>) attributes {dimension_semantics = [#tpu.dimension_semantics<parallel>], iteration_bounds = array<i64: 2>, scalar_prefetch = 0 : i64, scratch_operands = 2 : i64, tpu.core_type = #tpu.core_type<tc>, window_params = [{transform_indices = @transform_0, window_bounds = array<i64: 1, 32, 256>}, {pipeline_mode = #tpu.pipeline_mode<synchronous>, transform_indices = @transform_1, window_bounds = array<i64: 2, 256>}, {pipeline_mode = #tpu.pipeline_mode<synchronous>, transform_indices = @transform_2, window_bounds = array<i64: 32, 288>}, {pipeline_mode = #tpu.pipeline_mode<synchronous>, transform_indices = @transform_3, window_bounds = array<i64: 32, 1>}, {pipeline_mode = #tpu.pipeline_mode<synchronous>, transform_indices = @transform_4, window_bounds = array<i64: 32, 288>}, {pipeline_mode = #tpu.pipeline_mode<synchronous>, transform_indices = @transform_5, window_bounds = array<i64: 32, 1>}, {transform_indices = @transform_6, window_bounds = array<i64: 1, 32, 256>}]} {
    %c0 = arith.constant 0 : index
    %c0_0 = arith.constant 0 : index
    %0 = vector.load %arg2[%c0, %c0_0] : memref<2x256xf32, #tpu.memory_space<vmem>>, vector<2x256xf32>
    %1 = vector.extract_strided_slice %0 {offsets = [0, 0], sizes = [1, 256], strides = [1, 1]} : vector<2x256xf32> to vector<1x256xf32>
    %2 = vector.extract_strided_slice %0 {offsets = [1, 0], sizes = [1, 256], strides = [1, 1]} : vector<2x256xf32> to vector<1x256xf32>
    %cst = arith.constant 0.000000e+00 : f32
    %3 = vector.broadcast %cst : f32 to vector<32x17xf32>
    %c0_1 = arith.constant 0 : index
    %c111 = arith.constant 111 : index
    %4 = vector.load %arg8[%c0_1, %c111] : memref<32x512xf32, #tpu.memory_space<vmem>>, vector<32x17xf32>
    tpu.vector_store %arg8[%c0_1, %c111], %3 {strides = array<i32>} : memref<32x512xf32, #tpu.memory_space<vmem>>, vector<32x17xf32>,
    %c0_2 = arith.constant 0 : index
    %c384 = arith.constant 384 : index
    %5 = vector.load %arg8[%c0_2, %c384] : memref<32x512xf32, #tpu.memory_space<vmem>>, vector<32x17xf32>
    tpu.vector_store %arg8[%c0_2, %c384], %3 {strides = array<i32>} : memref<32x512xf32, #tpu.memory_space<vmem>>, vector<32x17xf32>,
    %c0_3 = arith.constant 0 : index
    %c0_4 = arith.constant 0 : index
    %c0_5 = arith.constant 0 : index
    %6 = vector.load %arg1[%c0_3, %c0_4, %c0_5] : memref<1x32x256xf32, #tpu.memory_space<vmem>>, vector<1x32x256xf32>
    %7 = vector.shape_cast %6 : vector<1x32x256xf32> to vector<32x256xf32>
    %c0_6 = arith.constant 0 : index
    %c128 = arith.constant 128 : index
    %8 = vector.load %arg8[%c0_6, %c128] : memref<32x512xf32, #tpu.memory_space<vmem>>, vector<32x256xf32>
    tpu.vector_store %arg8[%c0_6, %c128], %7 {strides = array<i32>} : memref<32x512xf32, #tpu.memory_space<vmem>>, vector<32x256xf32>,
    %c0_7 = arith.constant 0 : index
    %c0_8 = arith.constant 0 : index
    %9 = vector.load %arg3[%c0_7, %c0_8] : memref<32x288xf32, #tpu.memory_space<vmem>>, vector<32x288xf32>
    %c0_9 = arith.constant 0 : index
    %c0_10 = arith.constant 0 : index
    %10 = vector.load %arg4[%c0_9, %c0_10] : memref<32x1xf32, #tpu.memory_space<vmem>>, vector<32x1xf32>
    %c0_11 = arith.constant 0 : index
    %c111_12 = arith.constant 111 : index
    %11 = vector.load %arg8[%c0_11, %c111_12] : memref<32x512xf32, #tpu.memory_space<vmem>>, vector<32x256xf32>
    %12 = vector.broadcast %1 : vector<1x256xf32> to vector<32x256xf32>
    %13 = arith.mulf %11, %12 : vector<32x256xf32>
    %c0_13 = arith.constant 0 : index
    %c112 = arith.constant 112 : index
    %14 = vector.load %arg8[%c0_13, %c112] : memref<32x512xf32, #tpu.memory_space<vmem>>, vector<32x256xf32>
    %c0_14 = arith.constant 0 : index
    %c113 = arith.constant 113 : index
    %15 = vector.load %arg8[%c0_14, %c113] : memref<32x512xf32, #tpu.memory_space<vmem>>, vector<32x256xf32>
    %16 = vector.broadcast %2 : vector<1x256xf32> to vector<32x256xf32>
    %17 = arith.mulf %15, %16 : vector<32x256xf32>
    %c0_15 = arith.constant 0 : index
    %c127 = arith.constant 127 : index
    %18 = vector.load %arg8[%c0_15, %c127] : memref<32x512xf32, #tpu.memory_space<vmem>>, vector<32x256xf32>
    %19 = vector.broadcast %1 : vector<1x256xf32> to vector<32x256xf32>
    %20 = arith.mulf %18, %19 : vector<32x256xf32>
    %c0_16 = arith.constant 0 : index
    %c128_17 = arith.constant 128 : index
    %21 = vector.load %arg8[%c0_16, %c128_17] : memref<32x512xf32, #tpu.memory_space<vmem>>, vector<32x256xf32>
    %c0_18 = arith.constant 0 : index
    %c129 = arith.constant 129 : index
    %22 = vector.load %arg8[%c0_18, %c129] : memref<32x512xf32, #tpu.memory_space<vmem>>, vector<32x256xf32>
    %23 = vector.broadcast %2 : vector<1x256xf32> to vector<32x256xf32>
    %24 = arith.mulf %22, %23 : vector<32x256xf32>
    %c0_19 = arith.constant 0 : index
    %c143 = arith.constant 143 : index
    %25 = vector.load %arg8[%c0_19, %c143] : memref<32x512xf32, #tpu.memory_space<vmem>>, vector<32x256xf32>
    %26 = vector.broadcast %1 : vector<1x256xf32> to vector<32x256xf32>
    %27 = arith.mulf %25, %26 : vector<32x256xf32>
    %c0_20 = arith.constant 0 : index
    %c144 = arith.constant 144 : index
    %28 = vector.load %arg8[%c0_20, %c144] : memref<32x512xf32, #tpu.memory_space<vmem>>, vector<32x256xf32>
    %c0_21 = arith.constant 0 : index
    %c145 = arith.constant 145 : index
    %29 = vector.load %arg8[%c0_21, %c145] : memref<32x512xf32, #tpu.memory_space<vmem>>, vector<32x256xf32>
    %30 = vector.broadcast %2 : vector<1x256xf32> to vector<32x256xf32>
    %31 = arith.mulf %29, %30 : vector<32x256xf32>
    %32 = tpu.concatenate %13, %14, %17, %20, %21, %24, %27, %28, %31 in 0 : vector<32x256xf32>, vector<32x256xf32>, vector<32x256xf32>, vector<32x256xf32>, vector<32x256xf32>, vector<32x256xf32>, vector<32x256xf32>, vector<32x256xf32>, vector<32x256xf32> -> vector<288x256xf32>
    %cst_22 = arith.constant dense<0.000000e+00> : vector<32x256xf32>
    %33 = tpu.matmul %9, %32, %cst_22 {dimension_numbers = #tpu.dot_dimension_numbers<[1], [0], [0], [1], [0, 0, 1, 1], [], []>} : vector<32x288xf32>, vector<288x256xf32>, vector<32x256xf32> -> vector<32x256xf32>
    %34 = vector.broadcast %10 : vector<32x1xf32> to vector<32x256xf32>
    %35 = arith.addf %33, %34 : vector<32x256xf32>
    %cst_23 = arith.constant 2.000000e-01 : f32
    %36 = vector.broadcast %cst_23 : f32 to vector<32x256xf32>
    %37 = arith.mulf %36, %35 : vector<32x256xf32>
    %38 = arith.maximumf %35, %37 : vector<32x256xf32>
    %cst_24 = arith.constant 0.000000e+00 : f32
    %39 = vector.broadcast %cst_24 : f32 to vector<32x17xf32>
    %c0_25 = arith.constant 0 : index
    %c111_26 = arith.constant 111 : index
    %40 = vector.load %arg9[%c0_25, %c111_26] : memref<32x512xf32, #tpu.memory_space<vmem>>, vector<32x17xf32>
    tpu.vector_store %arg9[%c0_25, %c111_26], %39 {strides = array<i32>} : memref<32x512xf32, #tpu.memory_space<vmem>>, vector<32x17xf32>,
    %c0_27 = arith.constant 0 : index
    %c384_28 = arith.constant 384 : index
    %41 = vector.load %arg9[%c0_27, %c384_28] : memref<32x512xf32, #tpu.memory_space<vmem>>, vector<32x17xf32>
    tpu.vector_store %arg9[%c0_27, %c384_28], %39 {strides = array<i32>} : memref<32x512xf32, #tpu.memory_space<vmem>>, vector<32x17xf32>,
    %c0_29 = arith.constant 0 : index
    %c128_30 = arith.constant 128 : index
    %42 = vector.load %arg9[%c0_29, %c128_30] : memref<32x512xf32, #tpu.memory_space<vmem>>, vector<32x256xf32>
    tpu.vector_store %arg9[%c0_29, %c128_30], %38 {strides = array<i32>} : memref<32x512xf32, #tpu.memory_space<vmem>>, vector<32x256xf32>,
    %c0_31 = arith.constant 0 : index
    %c0_32 = arith.constant 0 : index
    %43 = vector.load %arg5[%c0_31, %c0_32] : memref<32x288xf32, #tpu.memory_space<vmem>>, vector<32x288xf32>
    %c0_33 = arith.constant 0 : index
    %c0_34 = arith.constant 0 : index
    %44 = vector.load %arg6[%c0_33, %c0_34] : memref<32x1xf32, #tpu.memory_space<vmem>>, vector<32x1xf32>
    %c0_35 = arith.constant 0 : index
    %c111_36 = arith.constant 111 : index
    %45 = vector.load %arg9[%c0_35, %c111_36] : memref<32x512xf32, #tpu.memory_space<vmem>>, vector<32x256xf32>
    %46 = vector.broadcast %1 : vector<1x256xf32> to vector<32x256xf32>
    %47 = arith.mulf %45, %46 : vector<32x256xf32>
    %c0_37 = arith.constant 0 : index
    %c112_38 = arith.constant 112 : index
    %48 = vector.load %arg9[%c0_37, %c112_38] : memref<32x512xf32, #tpu.memory_space<vmem>>, vector<32x256xf32>
    %c0_39 = arith.constant 0 : index
    %c113_40 = arith.constant 113 : index
    %49 = vector.load %arg9[%c0_39, %c113_40] : memref<32x512xf32, #tpu.memory_space<vmem>>, vector<32x256xf32>
    %50 = vector.broadcast %2 : vector<1x256xf32> to vector<32x256xf32>
    %51 = arith.mulf %49, %50 : vector<32x256xf32>
    %c0_41 = arith.constant 0 : index
    %c127_42 = arith.constant 127 : index
    %52 = vector.load %arg9[%c0_41, %c127_42] : memref<32x512xf32, #tpu.memory_space<vmem>>, vector<32x256xf32>
    %53 = vector.broadcast %1 : vector<1x256xf32> to vector<32x256xf32>
    %54 = arith.mulf %52, %53 : vector<32x256xf32>
    %c0_43 = arith.constant 0 : index
    %c128_44 = arith.constant 128 : index
    %55 = vector.load %arg9[%c0_43, %c128_44] : memref<32x512xf32, #tpu.memory_space<vmem>>, vector<32x256xf32>
    %c0_45 = arith.constant 0 : index
    %c129_46 = arith.constant 129 : index
    %56 = vector.load %arg9[%c0_45, %c129_46] : memref<32x512xf32, #tpu.memory_space<vmem>>, vector<32x256xf32>
    %57 = vector.broadcast %2 : vector<1x256xf32> to vector<32x256xf32>
    %58 = arith.mulf %56, %57 : vector<32x256xf32>
    %c0_47 = arith.constant 0 : index
    %c143_48 = arith.constant 143 : index
    %59 = vector.load %arg9[%c0_47, %c143_48] : memref<32x512xf32, #tpu.memory_space<vmem>>, vector<32x256xf32>
    %60 = vector.broadcast %1 : vector<1x256xf32> to vector<32x256xf32>
    %61 = arith.mulf %59, %60 : vector<32x256xf32>
    %c0_49 = arith.constant 0 : index
    %c144_50 = arith.constant 144 : index
    %62 = vector.load %arg9[%c0_49, %c144_50] : memref<32x512xf32, #tpu.memory_space<vmem>>, vector<32x256xf32>
    %c0_51 = arith.constant 0 : index
    %c145_52 = arith.constant 145 : index
    %63 = vector.load %arg9[%c0_51, %c145_52] : memref<32x512xf32, #tpu.memory_space<vmem>>, vector<32x256xf32>
    %64 = vector.broadcast %2 : vector<1x256xf32> to vector<32x256xf32>
    %65 = arith.mulf %63, %64 : vector<32x256xf32>
    %66 = tpu.concatenate %47, %48, %51, %54, %55, %58, %61, %62, %65 in 0 : vector<32x256xf32>, vector<32x256xf32>, vector<32x256xf32>, vector<32x256xf32>, vector<32x256xf32>, vector<32x256xf32>, vector<32x256xf32>, vector<32x256xf32>, vector<32x256xf32> -> vector<288x256xf32>
    %cst_53 = arith.constant dense<0.000000e+00> : vector<32x256xf32>
    %67 = tpu.matmul %43, %66, %cst_53 {dimension_numbers = #tpu.dot_dimension_numbers<[1], [0], [0], [1], [0, 0, 1, 1], [], []>} : vector<32x288xf32>, vector<288x256xf32>, vector<32x256xf32> -> vector<32x256xf32>
    %68 = vector.broadcast %44 : vector<32x1xf32> to vector<32x256xf32>
    %69 = arith.addf %67, %68 : vector<32x256xf32>
    %cst_54 = arith.constant 2.000000e-01 : f32
    %70 = vector.broadcast %cst_54 : f32 to vector<32x256xf32>
    %71 = arith.mulf %70, %69 : vector<32x256xf32>
    %72 = arith.maximumf %69, %71 : vector<32x256xf32>
    %73 = vector.shape_cast %72 : vector<32x256xf32> to vector<1x32x256xf32>
    %c0_55 = arith.constant 0 : index
    %c0_56 = arith.constant 0 : index
    %c0_57 = arith.constant 0 : index
    %74 = vector.load %arg7[%c0_55, %c0_56, %c0_57] : memref<1x32x256xf32, #tpu.memory_space<vmem>>, vector<1x32x256xf32>
    tpu.vector_store %arg7[%c0_55, %c0_56, %c0_57], %73 {strides = array<i32>} : memref<1x32x256xf32, #tpu.memory_space<vmem>>, vector<1x32x256xf32>,
    return
  }
  func.func @transform_0(%arg0: i32) -> (i32, i32, i32) {
    %c0_i32 = arith.constant 0 : i32
    %c0_i32_0 = arith.constant 0 : i32
    %c0_i32_1 = arith.constant 0 : i32
    return %arg0, %c0_i32, %c0_i32_0 : i32, i32, i32
  }
  func.func @transform_1(%arg0: i32) -> (i32, i32) {
    %c0_i32 = arith.constant 0 : i32
    %c0_i32_0 = arith.constant 0 : i32
    %c0_i32_1 = arith.constant 0 : i32
    return %c0_i32, %c0_i32_0 : i32, i32
  }
  func.func @transform_2(%arg0: i32) -> (i32, i32) {
    %c0_i32 = arith.constant 0 : i32
    %c0_i32_0 = arith.constant 0 : i32
    %c0_i32_1 = arith.constant 0 : i32
    return %c0_i32, %c0_i32_0 : i32, i32
  }
  func.func @transform_3(%arg0: i32) -> (i32, i32) {
    %c0_i32 = arith.constant 0 : i32
    %c0_i32_0 = arith.constant 0 : i32
    %c0_i32_1 = arith.constant 0 : i32
    return %c0_i32, %c0_i32_0 : i32, i32
  }
  func.func @transform_4(%arg0: i32) -> (i32, i32) {
    %c0_i32 = arith.constant 0 : i32
    %c0_i32_0 = arith.constant 0 : i32
    %c0_i32_1 = arith.constant 0 : i32
    return %c0_i32, %c0_i32_0 : i32, i32
  }
  func.func @transform_5(%arg0: i32) -> (i32, i32) {
    %c0_i32 = arith.constant 0 : i32
    %c0_i32_0 = arith.constant 0 : i32
    %c0_i32_1 = arith.constant 0 : i32
    return %c0_i32, %c0_i32_0 : i32, i32
  }
  func.func @transform_6(%arg0: i32) -> (i32, i32, i32) {
    %c0_i32 = arith.constant 0 : i32
    %c0_i32_0 = arith.constant 0 : i32
    %c0_i32_1 = arith.constant 0 : i32
    return %arg0, %c0_i32, %c0_i32_0 : i32, i32, i32
  }
}

</mosaic_0001>

<bundles_post_ra>
// kernel: tpu_custom_call.1
= control target key start
LH: loop header
LB: loop body
LE: loop exit
PB: predicated region body
PF: predicated region fallthrough
CT: control target
= control target key end

     0   :  { %11 = vsyncpa [#allocation5], 0  ;;  %s5015_s0 = inlined_call_operand.hbm [shape: f32[2,32,256], index: 0, kind: input, shape index: {}]   ;;  %s5016_s1 = inlined_call_operand.vmem [shape: f32[2,256], index: 1, kind: input, shape index: {}]   ;;  %s5017_s2 = inlined_call_operand.hbm [shape: f32[32,288], index: 2, kind: input, shape index: {}]   ;;  %s5018_s3 = inlined_call_operand.vmem [shape: f32[32,1], index: 3, kind: input, shape index: {}]   ;;  %s5019_s4 = inlined_call_operand.hbm [shape: f32[32,288], index: 4, kind: input, shape index: {}]   ;;  %s5020_s5 = inlined_call_operand.vmem [shape: f32[32,1], index: 5, kind: input, shape index: {}]   ;;  %s5021_s6 = inlined_call_operand.hbm [shape: f32[2,32,256], index: 6, kind: output, shape index: {}]  }
   0x1   :  { %13 = vsyncpa [#allocation5 + $0x1], 0 }
   0x2   :  { %14 = vsyncpa [#allocation8], 0 }
   0x3   :  { %15 = vsyncpa [#allocation6], 0 }
   0x4   :  { %17 = vsyncpa [#allocation6 + $0x1], 0  ;;  %s2967_s21 = smov 0   ;;  %s2969_s22 = smov 0  }
   0x5   :  { %s2971_s23 = smov 0   ;;  %s2973_s24 = smov 0  }
   0x6 LB: > { %s2988_s25 = sadd.s32 4294967295, %s2906_s24   ;;  %s2633_s26 = sadd.s32 4294967294, %s2906_s24   ;;  %s2906_s24 = sphi %s2973_s24, %s5134_s24   ;;  %s2902_s23 = sphi %s2971_s23, %s5133_s23   ;;  %s2898_s22 = sphi %s2969_s22, %s5132_s22   ;;  %s2894_s21 = sphi %s2967_s21, %s5131_s21  }
   0x7   : > { %p43_p0 = scmp.ne.s32.totalorder %s2898_s22, %s2894_s21  ;;  %p5022_p1 = scmp.eq.s32.totalorder %s2988_s25, 0 }
   0x8   : > { %p178_p3 = scmp.eq.s32.totalorder %s2633_s26, 1  ;;  %p2634_p5 = scmp.ge.s32.totalorder %s2906_s24, 1 }
   0x9   : > { %p2997_p4 = por %p5022_p1, %p43_p0  ;;  %p185_p7 = scmp.lt.s32.totalorder %s2906_s24, 3 }
   0xa   : > { %p3002_p6 = por %p178_p3, %p43_p0  ;;  %s2908_s30 = smov [#allocation7]  }
   0xb   : > { %s5065_s27 = scalar_select %p2997_p4, 1, 0 }
   0xc   : > { %s5066_s28 = scalar_select %p3002_p6, 1, 0 }
   0xd   : > { %p3007_p8 = pnand %p2634_p5, %p185_p7  ;;  %s200_s7 = sshll.u32 %s2908_s30, 4  ;;  %s201_s7 = int_to_ptr.vmem [resolvable:$true] %s200_s7 }
   0xe   : > { %s2909_s9 = smov [#allocation9]   ;;  %s2769_s11 = scalar_lea.vmem %s201_s7, 1536 }
   0xf   : > { %s5067_s29 = scalar_select %p3007_p8, 1, 0 }
  0x10   : > { %p2681_p9 = pneg %p3007_p8  ;;  %s216_s10 = sshll.u32 %s2909_s9, 4  ;;  %s217_s10 = int_to_ptr.vmem [resolvable:$true] %s216_s10 }
  0x11   : > { %p2770_p13 = scmp.ne.s32.totalorder %s201_s7, %s2769_s11  ;;  %p2777_p5 = scmp.lt.s32.totalorder %s201_s7, %s201_s7 }
  0x12   : > { %p3016_p11 = pnand %p2681_p9, %p5022_p1  ;;  %p2778_p7 = scmp.lt.s32.totalorder %s2769_s11, %s2769_s11 }
  0x14   : > { %p2760_p12 = pneg %p3016_p11  ;;  %p2779_p10 = por %p2778_p7, %p2777_p5 }
  0x16   : > { %p2772_p0 = pnand %p2770_p13, %p2760_p12 }
  0x18   : > { %p2773_p3 = pneg %p2772_p0 }
  0x1a   : > { %p2780_p9 = pnand %p2779_p10, %p2773_p3 }
  0x1c   : > { %2783 = shalt.err (!%p2780_p9)
}
  0x1d   : > { %s2910_s12 = smov 384   ;;  %s2911_s13 = smov 24  }
  0x1e   : > { %2684 = dma.hbm_to_vmem [thread:$0]  (!%p3016_p11), %s5017_s2, 1536, %s201_s7, [#allocation8], %s2910_s12, %s2910_s12, %s2911_s13  }
  0x1f   : > { %s2795_s16 = scalar_lea.vmem %s217_s10, 1536  ;;  %p2803_p2 = scmp.lt.s32.totalorder %s217_s10, %s217_s10 }
  0x20   : > { %p2796_p1 = scmp.ne.s32.totalorder %s217_s10, %s2795_s16  ;;  %p2804_p6 = scmp.lt.s32.totalorder %s2795_s16, %s2795_s16 }
  0x22   : > { %p2798_p13 = pnand %p2796_p1, %p2760_p12  ;;  %p2805_p5 = por %p2804_p6, %p2803_p2 }
  0x24   : > { %p2799_p0 = pneg %p2798_p13 }
  0x26   : > { %p2806_p10 = pnand %p2805_p5, %p2799_p0 }
  0x28   : > { %2809 = shalt.err (!%p2806_p10)
}
  0x29   : > { %2687 = dma.hbm_to_vmem [thread:$0]  (!%p3016_p11), %s5019_s4, 1536, %s217_s10, [#allocation8], %s2910_s12, %s2910_s12, %s2911_s13  }
  0x2a   : > { %s3039_s19 = sadd.s32 1, %s2906_s24   ;;  %s30_s20 = sadd.s32 1, %s2902_s23 }
  0x2b   : > { %s27_s26 = ssub.s32 %s2906_s24, %s3039_s19  ;;  %p37_p1 = scmp.ne.s32.totalorder %s2902_s23, %s2898_s22 }
  0x2c   : > { %p28_p2 = scmp.eq.s32.totalorder %s27_s26, 0  ;;  %p38_p6 = scmp.eq.s32.totalorder %s2906_s24, 0 }
  0x2d   : > { %p5069_p12 = scmp.eq.s32.totalorder %s2988_s25, 1  ;;  %p2698_p7 = scmp.lt.s32.totalorder %s2906_s24, 2 }
  0x2e   : > { %s3055_s7 = scalar_select %p28_p2, %s2902_s23, %s30_s20  }
  0x2f   : > { %p3049_p3 = por %p5069_p12, %p37_p1  ;;  %p39_p9 = por %p38_p6, %p37_p1 }
  0x30   : > { %s233_s8 = sand.u32 1, %s2902_s23   ;;  %s2659_s10 = sshll.u32 %s2906_s24, 10 }
  0x31   : > { %s5070_s30 = scalar_select %p3049_p3, 1, 0 }
  0x32   : > { %s2638_s9 = sshll.u32 %s233_s8, 6  ;;  %s3062_s13 = scalar_lea.hbm %s5015_s0, %s2659_s10 }
  0x33   : > { %s237_s14 = scalar_lea.vmem [#allocation4], %s2638_s9  ;;  %p3066_p11 = pnand %p2698_p7, %p39_p9 }
  0x34   : > { %s244_s15 = sshll.u32 %s237_s14, 4  ;;  %s3070_s17 = scalar_lea.sflag [#allocation5], %s233_s8  ;;  %s3064_s15 = int_to_ptr.vmem [resolvable:$true] %s244_s15 }
  0x35   : > { %s2810_s18 = scalar_lea.hbm %s3062_s13, 1024  ;;  %p2812_p0 = pneg %p3066_p11 }
  0x36   : > { %p2811_p13 = scmp.ne.s32.totalorder %s3062_s13, %s2810_s18  ;;  %s2815_s9 = scalar_lea.hbm %s5015_s0, 2048 }
  0x37   : > { %p2816_p1 = scmp.lt.s32.totalorder %s3062_s13, %s5015_s0  ;;  %p2817_p2 = scmp.lt.s32.totalorder %s2815_s9, %s2810_s18 }
  0x38   : > { %p2813_p5 = pnand %p2812_p0, %p2811_p13 }
  0x39   : > { %p2818_p6 = por %p2817_p2, %p2816_p1 }
  0x3a   : > { %p2814_p10 = pneg %p2813_p5 }
  0x3c   : > { %p2819_p12 = pnand %p2818_p6, %p2814_p10 }
  0x3e   : > { %2822 = shalt.err (!%p2819_p12)
}
  0x3f   : > { %s2823_s8 = scalar_lea.vmem %s3064_s15, 1024  ;;  %s2912_s12 = smov [#allocation4]  }
  0x40   : > { %p2824_p7 = scmp.ne.s32.totalorder %s3064_s15, %s2823_s8  ;;  %s2828_s14 = sshll.u32 %s2912_s12, 4  ;;  %s2829_s14 = int_to_ptr.vmem [resolvable:$false] %s2828_s14 }
  0x41   : > { %s2830_s20 = scalar_lea.vmem %s2829_s14, 2048  ;;  %p2831_p5 = scmp.lt.s32.totalorder %s3064_s15, %s2829_s14 }
  0x42   : > { %p2826_p9 = pnand %p2824_p7, %p2812_p0  ;;  %p2832_p3 = scmp.lt.s32.totalorder %s2830_s20, %s2823_s8 }
  0x44   : > { %p2827_p13 = pneg %p2826_p9  ;;  %p2833_p4 = por %p2832_p3, %p2831_p5 }
  0x46   : > { %p2834_p8 = pnand %p2833_p4, %p2827_p13 }
  0x48   : > { %2837 = shalt.err (!%p2834_p8)
}
  0x49   : > { %s2913_s18 = smov 256   ;;  %s2914_s26 = smov 16  }
  0x4a   : > { %2691 = dma.hbm_to_vmem [thread:$0]  (!%p3066_p11), %s3062_s13, 1024, %s3064_s15, %s3070_s17, %s2913_s18, %s2913_s18, %s2914_s26  }
  0x4b   : > { %p5072_p0 = scmp.ne.s32.totalorder %s5067_s29, 0 }
  0x4d   : > { %256 = sbr.rel (%p5072_p0) target bundleno = 1572 (0x624), region = 44 }
  0x52   : > { %s3094_s9 = sand.u32 1, %s2898_s22   ;;  %p5073_p4 = scmp.ne.s32.totalorder %s5065_s27, 0 }
  0x53   : > { %s5060_s10 = sshll.u32 %s3094_s9, 6  ;;  %s259_s11 = scalar_lea.sflag [#allocation5], %s3094_s9 }
  0x54   : > { %s3100_s8 = scalar_lea.vmem [#allocation4], %s5060_s10 }
  0x55   : > { %2881 = dma.done.wait (%p5073_p4), %s259_s11, 1024  }
  0x56   : > { %2883 = vsyncadd (%p5073_p4), %s259_s11, 4294966272  ;;  %p5074_p8 = scmp.eq.s32.totalorder %s2988_s25, 0 }
  0x58   : > { %2885 = dma.done.wait (%p5074_p8), [#allocation8], 3072   ;;  %p5075_p3 = pmov %p5074_p8 }
  0x59   : > { %v355_v0 = vlaneseq  ;;  %vm300_vm0 = vcmask 1048440   ;;  %v5026_v1 = vmov 0.0   ;;  %vm305_vm1 = vcmask 138240   ;;  %v299_v7 = vld [vmem:[%s5016_s1] sm:$0xf]  ;;  %v3142_v9 = vld [vmem:[%s3100_s8 + $0x8] sm:$0xff] }
  0x5a   : > { %2887 = vsyncadd (%p5075_p3), [#allocation8], 4294964224  ;;  %301 = vst.msk [vmem:[#allocation2] sm:$0xff] %vm300_vm0, %v5026_v1  ;;  %1424 = vmatprep.mubr.f32.mxu1 %v5026_v1  ;;  %v3139_v8 = vld [vmem:[%s3100_s8] sm:$0xff]  ;;  %v3145_v14 = vld [vmem:[%s3100_s8 + $0x10] sm:$0xff]  ;;  %s2916_s13 = smov 113  }
  0x5b   : > { %302 = vst.msk [vmem:[#allocation2 + $0x20] sm:$0xff] %vm300_vm0, %v5026_v1  ;;  %303 = vst.msk [vmem:[#allocation2 + $0x40] sm:$0xff] %vm300_vm0, %v5026_v1  ;;  %v356_v2 = vshrl.u32 %v355_v0, 7  ;;  %v3148_v15 = vld [vmem:[%s3100_s8 + $0x18] sm:$0xff]  ;;  %v3151_v16 = vld [vmem:[%s3100_s8 + $0x20] sm:$0xff]  ;;  %s2917_s15 = smov 127  }
  0x5c   : > { %304 = vst.msk [vmem:[#allocation2 + $0x60] sm:$0xff] %vm300_vm0, %v5026_v1  ;;  %1465 = vst.msk [vmem:[#allocation3] sm:$0xff] %vm300_vm0, %v5026_v1  ;;  %v3154_v19 = vld [vmem:[%s3100_s8 + $0x28] sm:$0xff]  ;;  %v3157_v20 = vld [vmem:[%s3100_s8 + $0x30] sm:$0xff]  ;;  %s5061_s16 = smov 111   ;;  %s2919_s17 = smov 1  }
  0x5d   : > { %1466 = vst.msk [vmem:[#allocation3 + $0x20] sm:$0xff] %vm300_vm0, %v5026_v1  ;;  %1467 = vst.msk [vmem:[#allocation3 + $0x40] sm:$0xff] %vm300_vm0, %v5026_v1  ;;  %v398_v3 = vsub.s32 1, %v356_v2  ;;  %v357_v4 = vsub.s32 0, %v356_v2  ;;  %v402_v5 = vsub.s32 3, %v356_v2  ;;  %v361_v6 = vsub.s32 2, %v356_v2 }
  0x5e   : > { %1468 = vst.msk [vmem:[#allocation3 + $0x60] sm:$0xff] %vm300_vm0, %v5026_v1  ;;  %v3160_v21 = vld [vmem:[%s3100_s8 + $0x38] sm:$0xff]  ;;  %s2920_s12 = smov 15   ;;  %s2921_s14 = smov 17   ;;  %vm441_vm2 = vcmask 1039360   ;;  %vm420_vm3 = vcmask 924672  }
  0x5f   : > { %309 = vst.msk [vmem:[#allocation2 + $0x78] sm:$0xff] %vm305_vm1, %v5026_v1  ;;  %306 = vst.msk [vmem:[#allocation2 + $0x18] sm:$0xff] %vm305_vm1, %v5026_v1  ;;  %v399_v10 = vrot.slane %v299_v7, %v398_v3  ;;  %v358_v11 = vrot.slane %v299_v7, %v357_v4  ;;  %v403_v12 = vrot.slane %v299_v7, %v402_v5  ;;  %s2922_s20 = smov 95   ;;  %s2923_s18 = smov 126   ;;  %vm495_vm4 = vcmask 121856  }
  0x60   : > { %307 = vst.msk [vmem:[#allocation2 + $0x38] sm:$0xff] %vm305_vm1, %v5026_v1  ;;  %308 = vst.msk [vmem:[#allocation2 + $0x58] sm:$0xff] %vm305_vm1, %v5026_v1  ;;  %v362_v13 = vrot.slane %v299_v7, %v361_v6  ;;  %s2924_s26 = smov 112   ;;  %s2925_s11 = smov 96   ;;  %vm474_vm5 = vcmask 7168   ;;  %vm657_vm6 = vcmask 916480  }
  0x61   : > { %1469 = vst.msk [vmem:[#allocation3 + $0x18] sm:$0xff] %vm305_vm1, %v5026_v1  ;;  %1470 = vst.msk [vmem:[#allocation3 + $0x38] sm:$0xff] %vm305_vm1, %v5026_v1  ;;  %v409_v17 = vrot.slane %v399_v10, %v398_v3  ;;  %v368_v18 = vrot.slane %v358_v11, %v357_v4  ;;  %v413_v22 = vrot.slane %v403_v12, %v398_v3  ;;  %v3168_v24 = vld [vmem:[#allocation2] sm:$0xff]  ;;  %s2926_s8 = smov 110   ;;  %s2927_s27 = smov 94   ;;  %vm612_vm7 = vcmask 1031168  }
  0x62   : > { %1471 = vst.msk [vmem:[#allocation3 + $0x58] sm:$0xff] %vm305_vm1, %v5026_v1  ;;  %1472 = vst.msk [vmem:[#allocation3 + $0x78] sm:$0xff] %vm305_vm1, %v5026_v1  ;;  %v372_v23 = vrot.slane %v362_v13, %v357_v4  ;;  %v3174_v25 = vld [vmem:[#allocation2 + $0x20] sm:$0xff]  ;;  %vm379_vm8 = vcmask 908288   ;;  %vm812_vm9 = vcmask 777216   ;;  %vm767_vm10 = vcmask 785408  }
  0x63   : > { %416 = vrot.lane.b32.xlu1 %v409_v17, %s2916_s13  ;;  %437 = vrot.lane.b32.xlu0 %v368_v18, %s2917_s15  ;;  %v3184_v26 = vld [vmem:[#allocation2 + $0x40] sm:$0xff]  ;;  %vm722_vm11 = vcmask 900096   ;;  %vm857_vm12 = vcmask 769024   ;;  %vm1258_vm13 = vcmask 261120   ;;  %s5105_s10 = smov 111   ;;  %s2660_s29 = sshll.u32 %s2988_s25, 10 }
  0x64   : > { %v3190_v27 = vld [vmem:[#allocation2 + $0x60] sm:$0xff]  ;;  %p5128_p10 = scmp.ne.s32.totalorder %s5070_s30, 0  ;;  %s2929_s25 = smov [#allocation10]  }
  0x66   : > { %v3204_v28 = vld [vmem:[#allocation2 + $0x78] sm:$0xff] }
  0x67   : > { %418 = vrot.lane.b32.xlu1 %v413_v22, %s2916_s13  ;;  %439 = vrot.lane.b32.xlu0 %v372_v23, %s2917_s15  ;;  %v3210_v29 = vld [vmem:[#allocation2 + $0x58] sm:$0xff] }
  0x68   : > { %v3220_v30 = vld [vmem:[#allocation2 + $0x38] sm:$0xff] }
  0x69   : > { %v3226_v31 = vld [vmem:[#allocation2 + $0x18] sm:$0xff] }
  0x6b   : > { %377 = vrot.lane.b32.xlu1 %v372_v23, %s5061_s16  ;;  %375 = vrot.lane.b32.xlu0 %v368_v18, %s5061_s16 }
  0x6f   : > { %472 = vrot.lane.b32.xlu1 %v413_v22, %s2919_s17  ;;  %470 = vrot.lane.b32.xlu0 %v409_v17, %s2919_s17 }
  0x73   : > { %493 = vrot.lane.b32.xlu1 %v372_v23, %s2920_s12  ;;  %491 = vrot.lane.b32.xlu0 %v368_v18, %s2920_s12 }
  0x77   : > { %512 = vrot.lane.b32.xlu0 %v409_v17, %s2921_s14  ;;  %514 = vrot.lane.b32.xlu1 %v413_v22, %s2921_s14 }
  0x7b   : > { %544 = vrot.lane.b32.xlu0 %v3168_v24, %s2917_s15  ;;  %546 = vrot.lane.b32.xlu1 %v3139_v8, %s2917_s15 }
  0x7f   : > { %548 = vrot.lane.b32.xlu0 %v3142_v9, %s2917_s15  ;;  %550 = vrot.lane.b32.xlu1 %v3174_v25, %s2917_s15 }
  0x83   : > { %552 = vrot.lane.b32.xlu0 %v3145_v14, %s2917_s15  ;;  %554 = vrot.lane.b32.xlu1 %v3148_v15, %s2917_s15 }
  0x87   : > { %556 = vrot.lane.b32.xlu0 %v3184_v26, %s2917_s15  ;;  %558 = vrot.lane.b32.xlu1 %v3151_v16, %s2917_s15 }
  0x8b   : > { %560 = vrot.lane.b32.xlu0 %v3154_v19, %s2917_s15  ;;  %562 = vrot.lane.b32.xlu1 %v3190_v27, %s2917_s15 }
  0x8f   : > { %564 = vrot.lane.b32.xlu0 %v3157_v20, %s2917_s15  ;;  %566 = vrot.lane.b32.xlu1 %v3160_v21, %s2917_s15 }
  0x93   : > { %806 = vrot.lane.b32.xlu0 %v3157_v20, %s2922_s20  ;;  %808 = vrot.lane.b32.xlu1 %v3160_v21, %s2922_s20 }
  0x97   : > { %810 = vrot.lane.b32.xlu0 %v3204_v28, %s2922_s20  ;;  %800 = vrot.lane.b32.xlu1 %v3151_v16, %s2922_s20 }
  0x9b   : > { %802 = vrot.lane.b32.xlu0 %v3154_v19, %s2922_s20  ;;  %804 = vrot.lane.b32.xlu1 %v3210_v29, %s2922_s20 }
  0x9f   : > { %794 = vrot.lane.b32.xlu0 %v3145_v14, %s2922_s20  ;;  %796 = vrot.lane.b32.xlu1 %v3148_v15, %s2922_s20 }
  0xa3   : > { %798 = vrot.lane.b32.xlu0 %v3220_v30, %s2922_s20  ;;  %788 = vrot.lane.b32.xlu1 %v3139_v8, %s2922_s20 }
  0xa7   : > { %790 = vrot.lane.b32.xlu0 %v3142_v9, %s2922_s20  ;;  %792 = vrot.lane.b32.xlu1 %v3226_v31, %s2922_s20 }
  0xd5   : > { %v3232_v32 = vpop.permute.xlu1 %416  ;;  %v3234_v33 = vpop.permute.xlu0 %437 }
  0xd6   : > { %5076 = vst [vmem:[#allocation14_spill] sm:$0xff] %v3232_v32  ;;  %5077 = vst [vmem:[#allocation15_spill] sm:$0xff] %v3234_v33  ;;  %v425_v34 = vmul.f32 %v3232_v32, %v3168_v24  ;;  %v455_v35 = vmul.f32 %v3234_v33, %v3190_v27  ;;  %v452_v39 = vmul.f32 %v3234_v33, %v3184_v26 }
  0xd7   : > { %v449_v40 = vmul.f32 %v3234_v33, %v3174_v25  ;;  %v446_v44 = vmul.f32 %v3234_v33, %v3168_v24  ;;  %v434_v45 = vmul.f32 %v3232_v32, %v3190_v27  ;;  %v431_v51 = vmul.f32 %v3232_v32, %v3184_v26 }
  0xd8   : > { %588 = vrot.lane.b32.xlu0 %v425_v34, %s2923_s18  ;;  %651 = vrot.lane.b32.xlu1 %v455_v35, %s2924_s26  ;;  %v428_v52 = vmul.f32 %v3232_v32, %v3174_v25 }
  0xd9   : > { %v3242_v36 = vpop.permute.xlu0 %439  ;;  %v3268_v46 = vpop.permute.xlu1 %418 }
  0xda   : > { %5078 = vst [vmem:[#allocation16_spill] sm:$0xff] %v3242_v36  ;;  %v457_v37 = vmul.f32 %v3242_v36, %v3160_v21  ;;  %v454_v38 = vmul.f32 %v3242_v36, %v3154_v19  ;;  %v451_v41 = vmul.f32 %v3242_v36, %v3148_v15  ;;  %v448_v42 = vmul.f32 %v3242_v36, %v3142_v9 }
  0xdb   : > { %5079 = vst [vmem:[#allocation17_spill] sm:$0xff] %v3268_v46  ;;  %v436_v47 = vmul.f32 %v3268_v46, %v3160_v21  ;;  %v433_v48 = vmul.f32 %v3268_v46, %v3154_v19  ;;  %v430_v55 = vmul.f32 %v3268_v46, %v3148_v15  ;;  %v427_v56 = vmul.f32 %v3268_v46, %v3142_v9 }
  0xdc   : > { %655 = vrot.lane.b32.xlu0 %v457_v37, %s2924_s26  ;;  %649 = vrot.lane.b32.xlu1 %v454_v38, %s2924_s26  ;;  %v3313_v62 = vsel %vm441_vm2, %v3234_v33, %v3242_v36  ;;  %v3335_v7 = vsel %vm420_vm3, %v3232_v32, %v3268_v46 }
  0xdd   : > { %v3262_v43 = vpop.permute.xlu0 %375  ;;  %v3276_v49 = vpop.permute.xlu1 %377  ;;  %5084 = vst [vmem:[#allocation22_spill] sm:$0xff] %v3313_v62  ;;  %v453_v0 = vmul.f32 %v3313_v62, %v3151_v16  ;;  %v456_v2 = vmul.f32 %v3313_v62, %v3157_v20  ;;  %v447_v4 = vmul.f32 %v3313_v62, %v3139_v8  ;;  %v450_v5 = vmul.f32 %v3313_v62, %v3145_v14 }
  0xde   : > { %5087 = vst [vmem:[#allocation25_spill] sm:$0xff] %v3335_v7  ;;  %v432_v11 = vmul.f32 %v3335_v7, %v3151_v16  ;;  %v435_v12 = vmul.f32 %v3335_v7, %v3157_v20  ;;  %v426_v17 = vmul.f32 %v3335_v7, %v3139_v8  ;;  %v429_v18 = vmul.f32 %v3335_v7, %v3145_v14 }
  0xe0   : > { %645 = vrot.lane.b32.xlu0 %v452_v39, %s2924_s26  ;;  %639 = vrot.lane.b32.xlu1 %v449_v40, %s2924_s26 }
  0xe1   : > { %v3278_v50 = vpop.permute.xlu0 %470  ;;  %v3288_v53 = vpop.permute.xlu1 %472 }
  0xe2   : > { %5080 = vst [vmem:[#allocation18_spill] sm:$0xff] %v3278_v50  ;;  %5081 = vst [vmem:[#allocation19_spill] sm:$0xff] %v3288_v53 }
  0xe4   : > { %643 = vrot.lane.b32.xlu0 %v451_v41, %s2924_s26  ;;  %637 = vrot.lane.b32.xlu1 %v448_v42, %s2924_s26 }
  0xe5   : > { %v3290_v54 = vpop.permute.xlu0 %491  ;;  %v3302_v59 = vpop.permute.xlu1 %493 }
  0xe6   : > { %5082 = vst [vmem:[#allocation20_spill] sm:$0xff] %v3290_v54  ;;  %v509_v57 = vmul.f32 %v3290_v54, %v3157_v20  ;;  %v506_v58 = vmul.f32 %v3290_v54, %v3151_v16  ;;  %5083 = vst [vmem:[#allocation21_spill] sm:$0xff] %v3302_v59  ;;  %v511_v60 = vmul.f32 %v3302_v59, %v3204_v28 }
  0xe7   : > { %v508_v61 = vmul.f32 %v3302_v59, %v3210_v29  ;;  %v3357_v23 = vsel %vm495_vm4, %v3290_v54, %v3302_v59  ;;  %v503_v39 = vmul.f32 %v3290_v54, %v3145_v14  ;;  %v505_v42 = vmul.f32 %v3302_v59, %v3220_v30 }
  0xe8   : > { %633 = vrot.lane.b32.xlu0 %v446_v44, %s2924_s26  ;;  %606 = vrot.lane.b32.xlu1 %v434_v45, %s2923_s18  ;;  %5088 = vst [vmem:[#allocation26_spill] sm:$0xff] %v3357_v23  ;;  %v510_v34 = vmul.f32 %v3357_v23, %v3160_v21  ;;  %v507_v35 = vmul.f32 %v3357_v23, %v3154_v19 }
  0xe9   : > { %v3317_v63 = vpop.permute.xlu1 %514  ;;  %v3323_v3 = vpop.permute.xlu0 %512  ;;  %v504_v40 = vmul.f32 %v3357_v23, %v3148_v15  ;;  %v500_v44 = vmul.f32 %v3290_v54, %v3139_v8 }
  0xea   : > { %5085 = vst [vmem:[#allocation23_spill] sm:$0xff] %v3317_v63  ;;  %5086 = vst [vmem:[#allocation24_spill] sm:$0xff] %v3323_v3  ;;  %v520_v54 = vmul.f32 %v3323_v3, %v3139_v8 }
  0xec   : > { %610 = vrot.lane.b32.xlu0 %v436_v47, %s2923_s18  ;;  %604 = vrot.lane.b32.xlu1 %v433_v48, %s2923_s18  ;;  %v502_v47 = vmul.f32 %v3302_v59, %v3226_v31  ;;  %v501_v48 = vmul.f32 %v3357_v23, %v3142_v9  ;;  %v525_v23 = vmul.f32 %v3317_v63, %v3220_v30 }
  0xed   : > { %v3331_v6 = vpop.permute.xlu1 %546  ;;  %v3339_v10 = vpop.permute.xlu0 %544 }
  0xf0   : > { %600 = vrot.lane.b32.xlu0 %v431_v51, %s2923_s18  ;;  %594 = vrot.lane.b32.xlu1 %v428_v52, %s2923_s18  ;;  %v3395_v52 = vsel %vm474_vm5, %v3278_v50, %v3288_v53 }
  0xf1   : > { %v3347_v13 = vpop.permute.xlu1 %550  ;;  %v3353_v22 = vpop.permute.xlu0 %548  ;;  %5089 = vst [vmem:[#allocation27_spill] sm:$0xff] %v3395_v52 }
  0xf4   : > { %598 = vrot.lane.b32.xlu0 %v430_v55, %s2923_s18  ;;  %592 = vrot.lane.b32.xlu1 %v427_v56, %s2923_s18  ;;  %v489_v56 = vmul.f32 %v3395_v52, %v3160_v21 }
  0xf5   : > { %v3365_v37 = vpop.permute.xlu1 %554  ;;  %v3369_v38 = vpop.permute.xlu0 %552 }
  0xf8   : > { %761 = vrot.lane.b32.xlu0 %v509_v57, %s2925_s11  ;;  %755 = vrot.lane.b32.xlu1 %v506_v58, %s2925_s11  ;;  %v488_v57 = vmul.f32 %v3278_v50, %v3157_v20 }
  0xf9   : > { %v3377_v41 = vpop.permute.xlu1 %558  ;;  %v3383_v45 = vpop.permute.xlu0 %556 }
  0xfc   : > { %765 = vrot.lane.b32.xlu0 %v511_v60, %s2925_s11  ;;  %759 = vrot.lane.b32.xlu1 %v508_v61, %s2925_s11  ;;  %v485_v60 = vmul.f32 %v3278_v50, %v3151_v16  ;;  %v490_v61 = vmul.f32 %v3288_v53, %v3204_v28 }
  0xfd   : > { %v3391_v51 = vpop.permute.xlu1 %562  ;;  %v3399_v55 = vpop.permute.xlu0 %560 }
 0x100   : > { %647 = vrot.lane.b32.xlu0 %v453_v0, %s2924_s26  ;;  %653 = vrot.lane.b32.xlu1 %v456_v2, %s2924_s26  ;;  %v487_v2 = vmul.f32 %v3288_v53, %v3210_v29 }
 0x101   : > { %v3407_v58 = vpop.permute.xlu1 %566  ;;  %v3413_v0 = vpop.permute.xlu0 %564 }
 0x104   : > { %635 = vrot.lane.b32.xlu0 %v447_v4, %s2924_s26  ;;  %641 = vrot.lane.b32.xlu1 %v450_v5, %s2924_s26  ;;  %v486_v4 = vmul.f32 %v3395_v52, %v3154_v19 }
 0x105   : > { %v3421_v5 = vpop.permute.xlu1 %808 }
 0x108   : > { %602 = vrot.lane.b32.xlu0 %v432_v11, %s2923_s18  ;;  %608 = vrot.lane.b32.xlu1 %v435_v12, %s2923_s18  ;;  %v3425_v11 = vpop.permute.xlu0 %806  ;;  %v483_v12 = vmul.f32 %v3395_v52, %v3148_v15 }
 0x10c   : > { %590 = vrot.lane.b32.xlu0 %v426_v17, %s2923_s18  ;;  %596 = vrot.lane.b32.xlu1 %v429_v18, %s2923_s18  ;;  %v482_v17 = vmul.f32 %v3278_v50, %v3145_v14  ;;  %v3433_v18 = vpop.permute.xlu1 %800 }
 0x110   : > { %763 = vrot.lane.b32.xlu1 %v510_v34, %s2925_s11  ;;  %757 = vrot.lane.b32.xlu0 %v507_v35, %s2925_s11  ;;  %v479_v34 = vmul.f32 %v3278_v50, %v3139_v8  ;;  %v484_v35 = vmul.f32 %v3288_v53, %v3220_v30  ;;  %v522_v30 = vmul.f32 %v3317_v63, %v3226_v31 }
 0x114   : > { %749 = vrot.lane.b32.xlu0 %v503_v39, %s2925_s11  ;;  %751 = vrot.lane.b32.xlu1 %v504_v40, %s2925_s11  ;;  %v3439_v39 = vpop.permute.xlu0 %810  ;;  %v481_v40 = vmul.f32 %v3288_v53, %v3226_v31 }
 0x118   : > { %753 = vrot.lane.b32.xlu0 %v505_v42, %s2925_s11  ;;  %743 = vrot.lane.b32.xlu1 %v500_v44, %s2925_s11  ;;  %v480_v42 = vmul.f32 %v3395_v52, %v3142_v9  ;;  %v3447_v44 = vpop.permute.xlu1 %804 }
 0x11c   : > { %747 = vrot.lane.b32.xlu1 %v502_v47, %s2925_s11  ;;  %745 = vrot.lane.b32.xlu0 %v501_v48, %s2925_s11  ;;  %v3451_v47 = vpop.permute.xlu0 %802  ;;  %v3457_v48 = vpop.permute.xlu1 %796 }
 0x120   : > { %718 = vrot.lane.b32.xlu1 %v489_v56, %s2926_s8  ;;  %716 = vrot.lane.b32.xlu0 %v488_v57, %s2926_s8  ;;  %v3459_v56 = vpop.permute.xlu0 %794  ;;  %v3464_v57 = vsel %vm305_vm1, %v3323_v3, %v3317_v63 }
 0x121   : > { %5090 = vst [vmem:[#allocation28_spill] sm:$0xff] %v3464_v57  ;;  %v524_v52 = vmul.f32 %v3464_v57, %v3148_v15  ;;  %v521_v46 = vmul.f32 %v3464_v57, %v3142_v9 }
 0x124   : > { %710 = vrot.lane.b32.xlu1 %v485_v60, %s2926_s8  ;;  %720 = vrot.lane.b32.xlu0 %v490_v61, %s2926_s8  ;;  %v529_v60 = vmul.f32 %v3323_v3, %v3157_v20  ;;  %v530_v61 = vmul.f32 %v3464_v57, %v3160_v21 }
 0x128   : > { %714 = vrot.lane.b32.xlu1 %v487_v2, %s2926_s8  ;;  %712 = vrot.lane.b32.xlu0 %v486_v4, %s2926_s8  ;;  %v3474_v2 = vpop.permute.xlu1 %788  ;;  %v3476_v4 = vpop.permute.xlu0 %798 }
 0x12c   : > { %706 = vrot.lane.b32.xlu1 %v483_v12, %s2926_s8  ;;  %704 = vrot.lane.b32.xlu0 %v482_v17, %s2926_s8  ;;  %v531_v12 = vmul.f32 %v3317_v63, %v3204_v28  ;;  %v3485_v17 = vpop.permute.xlu1 %792  ;;  %v528_v28 = vmul.f32 %v3317_v63, %v3210_v29  ;;  %v523_v29 = vmul.f32 %v3323_v3, %v3145_v14 }
 0x130   : > { %698 = vrot.lane.b32.xlu1 %v479_v34, %s2926_s8  ;;  %708 = vrot.lane.b32.xlu0 %v484_v35, %s2926_s8  ;;  %v3487_v34 = vpop.permute.xlu0 %790  ;;  %v526_v35 = vmul.f32 %v3323_v3, %v3151_v16 }
 0x134   : > { %702 = vrot.lane.b32.xlu1 %v481_v40, %s2926_s8  ;;  %700 = vrot.lane.b32.xlu0 %v480_v42, %s2926_s8 }
 0x138   : > { %680 = vrot.lane.b32.xlu1 %v3160_v21, %s5061_s16  ;;  %678 = vrot.lane.b32.xlu0 %v3157_v20, %s5061_s16 }
 0x13c   : > { %676 = vrot.lane.b32.xlu1 %v3154_v19, %s5061_s16  ;;  %674 = vrot.lane.b32.xlu0 %v3151_v16, %s5061_s16 }
 0x140   : > { %851 = vrot.lane.b32.xlu0 %v529_v60, %s2927_s27  ;;  %853 = vrot.lane.b32.xlu1 %v530_v61, %s2927_s27  ;;  %v527_v60 = vmul.f32 %v3464_v57, %v3154_v19 }
 0x144   : > { %855 = vrot.lane.b32.xlu0 %v531_v12, %s2927_s27  ;;  %670 = vrot.lane.b32.xlu1 %v3145_v14, %s5061_s16 }
 0x148   : > { %672 = vrot.lane.b32.xlu0 %v3148_v15, %s5061_s16  ;;  %845 = vrot.lane.b32.xlu1 %v526_v35, %s2927_s27 }
 0x14a   : > { %v652_v40 = vpop.permute.xlu1 %651  ;;  %v3494_v42 = vpop.permute.xlu0 %588 }
 0x14c   : > { %849 = vrot.lane.b32.xlu1 %v528_v28, %s2927_s27  ;;  %847 = vrot.lane.b32.xlu0 %v527_v60, %s2927_s27 }
 0x14e   : > { %v650_v61 = vpop.permute.xlu1 %649  ;;  %v656_v12 = vpop.permute.xlu0 %655 }
 0x150   : > { %666 = vrot.lane.b32.xlu1 %v3139_v8, %s5061_s16  ;;  %668 = vrot.lane.b32.xlu0 %v3142_v9, %s5061_s16  ;;  %s2528_s16 = scalar_lea.sflag [#allocation6], %s3094_s9 }
 0x152   : > { %v640_v35 = vpop.permute.xlu1 %639  ;;  %v646_v1 = vpop.permute.xlu0 %645 }
 0x154   : > { %839 = vrot.lane.b32.xlu1 %v523_v29, %s2927_s27  ;;  %841 = vrot.lane.b32.xlu0 %v524_v52, %s2927_s27 }
 0x156   : > { %v638_v28 = vpop.permute.xlu1 %637  ;;  %v644_v60 = vpop.permute.xlu0 %643 }
 0x158   : > { %843 = vrot.lane.b32.xlu1 %v525_v23, %s2927_s27  ;;  %835 = vrot.lane.b32.xlu0 %v521_v46, %s2927_s27 }
 0x15a   : > { %v607_v50 = vpop.permute.xlu1 %606  ;;  %v634_v36 = vpop.permute.xlu0 %633 }
 0x15c   : > { %833 = vrot.lane.b32.xlu1 %v520_v54, %s2927_s27  ;;  %992 = vrot.lane.b32.xlu0 %v656_v12, %s2921_s14 }
 0x15e   : > { %v605_v52 = vpop.permute.xlu1 %604  ;;  %v611_v29 = vpop.permute.xlu0 %610 }
 0x160   : > { %837 = vrot.lane.b32.xlu1 %v522_v30, %s2927_s27  ;;  %986 = vrot.lane.b32.xlu0 %v650_v61, %s2921_s14 }
 0x162   : > { %v595_v23 = vpop.permute.xlu1 %594  ;;  %v601_v46 = vpop.permute.xlu0 %600 }
 0x164   : > { %980 = vrot.lane.b32.xlu0 %v644_v60, %s2921_s14  ;;  %968 = vrot.lane.b32.xlu1 %v611_v29, %s2921_s14 }
 0x166   : > { %v593_v57 = vpop.permute.xlu1 %592  ;;  %v599_v7 = vpop.permute.xlu0 %598 }
 0x168   : > { %974 = vrot.lane.b32.xlu0 %v638_v28, %s2921_s14  ;;  %956 = vrot.lane.b32.xlu1 %v599_v7, %s2921_s14 }
 0x16a   : > { %v3530_v54 = vpop.permute.xlu1 %755  ;;  %v3532_v3 = vpop.permute.xlu0 %761 }
 0x16b   : > { %5091 = vst [vmem:[#allocation29_spill] sm:$0xff] %v3530_v54  ;;  %5092 = vst [vmem:[#allocation30_spill] sm:$0xff] %v3532_v3 }
 0x16c   : > { %962 = vrot.lane.b32.xlu0 %v605_v52, %s2921_s14 }
 0x16e   : > { %v3535_v31 = vpop.permute.xlu1 %759  ;;  %v3537_v30 = vpop.permute.xlu0 %765 }
 0x16f   : > { %5093 = vst [vmem:[#allocation31_spill] sm:$0xff] %v3535_v31  ;;  %5094 = vst [vmem:[#allocation32_spill] sm:$0xff] %v3537_v30 }
 0x172   : > { %v654_v62 = vpop.permute.xlu1 %653  ;;  %v648_v63 = vpop.permute.xlu0 %647 }
 0x173   : > { %v664_v53 = vsel %vm657_vm6, %v652_v40, %v654_v62  ;;  %v665_v59 = vsel %vm657_vm6, %v654_v62, %v656_v12  ;;  %v663_v54 = vsel %vm657_vm6, %v648_v63, %v650_v61  ;;  %v662_v3 = vsel %vm657_vm6, %v646_v1, %v648_v63 }
 0x174   : > { %988 = vrot.lane.b32.xlu0 %v664_v53, %s2921_s14  ;;  %990 = vrot.lane.b32.xlu1 %v665_v59, %s2921_s14 }
 0x176   : > { %v642_v32 = vpop.permute.xlu1 %641  ;;  %v636_v33 = vpop.permute.xlu0 %635 }
 0x177   : > { %v661_v40 = vsel %vm657_vm6, %v642_v32, %v644_v60  ;;  %v660_v62 = vsel %vm657_vm6, %v640_v35, %v642_v32  ;;  %v659_v1 = vsel %vm657_vm6, %v636_v33, %v638_v28  ;;  %v658_v12 = vsel %vm657_vm6, %v634_v36, %v636_v33 }
 0x178   : > { %984 = vrot.lane.b32.xlu1 %v663_v54, %s2921_s14  ;;  %982 = vrot.lane.b32.xlu0 %v662_v3, %s2921_s14 }
 0x17a   : > { %v609_v31 = vpop.permute.xlu1 %608  ;;  %v603_v30 = vpop.permute.xlu0 %602 }
 0x17b   : > { %v620_v61 = vsel %vm612_vm7, %v609_v31, %v611_v29  ;;  %v619_v32 = vsel %vm612_vm7, %v607_v50, %v609_v31  ;;  %v618_v29 = vsel %vm612_vm7, %v603_v30, %v605_v52  ;;  %v617_v36 = vsel %vm612_vm7, %v601_v46, %v603_v30 }
 0x17c   : > { %978 = vrot.lane.b32.xlu1 %v661_v40, %s2921_s14  ;;  %976 = vrot.lane.b32.xlu0 %v660_v62, %s2921_s14 }
 0x17e   : > { %v597_v53 = vpop.permute.xlu1 %596  ;;  %v591_v59 = vpop.permute.xlu0 %590 }
 0x17f   : > { %v616_v28 = vsel %vm612_vm7, %v597_v53, %v599_v7  ;;  %v615_v33 = vsel %vm612_vm7, %v595_v23, %v597_v53  ;;  %v614_v52 = vsel %vm612_vm7, %v591_v59, %v593_v57  ;;  %v575_v23 = vsel %vm441_vm2, %v3413_v0, %v3407_v58 }
 0x180   : > { %966 = vrot.lane.b32.xlu0 %v620_v61, %s2921_s14  ;;  %972 = vrot.lane.b32.xlu1 %v659_v1, %s2921_s14  ;;  %v613_v46 = vsel %vm612_vm7, %v3494_v42, %v591_v59  ;;  %v574_v53 = vsel %vm441_vm2, %v3391_v51, %v3413_v0  ;;  %v573_v59 = vsel %vm441_vm2, %v3377_v41, %v3399_v55 }
 0x181   : > { %v572_v0 = vsel %vm441_vm2, %v3383_v45, %v3377_v41  ;;  %v569_v45 = vsel %vm441_vm2, %v3331_v6, %v3353_v22 }
 0x182   : > { %v3555_v63 = vpop.permute.xlu1 %763  ;;  %v3557_v3 = vpop.permute.xlu0 %757 }
 0x184   : > { %964 = vrot.lane.b32.xlu0 %v619_v32, %s2921_s14  ;;  %970 = vrot.lane.b32.xlu1 %v658_v12, %s2921_s14  ;;  %v570_v12 = vsel %vm441_vm2, %v3347_v13, %v3369_v38 }
 0x186   : > { %v3563_v35 = vpop.permute.xlu1 %751  ;;  %v3565_v60 = vpop.permute.xlu0 %749 }
 0x188   : > { %954 = vrot.lane.b32.xlu0 %v616_v28, %s2921_s14  ;;  %960 = vrot.lane.b32.xlu1 %v618_v29, %s2921_s14  ;;  %v3649_v29 = vsel %vm379_vm8, %v3262_v43, %v3276_v49 }
 0x18a   : > { %v3571_v54 = vpop.permute.xlu1 %743  ;;  %v3573_v50 = vpop.permute.xlu0 %753 }
 0x18c   : > { %952 = vrot.lane.b32.xlu0 %v615_v33, %s2921_s14  ;;  %958 = vrot.lane.b32.xlu1 %v617_v36, %s2921_s14  ;;  %v568_v33 = vsel %vm441_vm2, %v3339_v10, %v3331_v6  ;;  %v392_v10 = vmul.f32 %v3276_v49, %v3154_v19 }
 0x18e   : > { %v3579_v31 = vpop.permute.xlu1 %747  ;;  %v3581_v7 = vpop.permute.xlu0 %745 }
 0x190   : > { %950 = vrot.lane.b32.xlu0 %v593_v57, %s2921_s14  ;;  %948 = vrot.lane.b32.xlu1 %v614_v52, %s2921_s14  ;;  %v393_v52 = vmul.f32 %v3262_v43, %v3190_v27 }
 0x192   : > { %v3586_v40 = vpop.permute.xlu1 %718  ;;  %v3588_v62 = vpop.permute.xlu0 %716 }
 0x194   : > { %942 = vrot.lane.b32.xlu0 %v575_v23, %s2921_s14  ;;  %946 = vrot.lane.b32.xlu1 %v613_v46, %s2921_s14  ;;  %v395_v23 = vmul.f32 %v3276_v49, %v3160_v21  ;;  %v391_v46 = vmul.f32 %v3649_v29, %v3151_v16 }
 0x196   : > { %v3597_v30 = vpop.permute.xlu1 %710  ;;  %v3599_v57 = vpop.permute.xlu0 %720 }
 0x198   : > { %940 = vrot.lane.b32.xlu0 %v574_v53, %s2921_s14  ;;  %944 = vrot.lane.b32.xlu1 %v3407_v58, %s2921_s14  ;;  %v571_v58 = vsel %vm441_vm2, %v3369_v38, %v3365_v37  ;;  %v394_v38 = vmul.f32 %v3649_v29, %v3157_v20  ;;  %v388_v53 = vmul.f32 %v3649_v29, %v3145_v14 }
 0x19a   : > { %v3607_v61 = vpop.permute.xlu1 %714  ;;  %v3609_v42 = vpop.permute.xlu0 %712 }
 0x19c   : > { %938 = vrot.lane.b32.xlu0 %v3399_v55, %s2921_s14  ;;  %936 = vrot.lane.b32.xlu1 %v573_v59, %s2921_s14  ;;  %v390_v59 = vmul.f32 %v3262_v43, %v3184_v26 }
 0x19e   : > { %v3617_v1 = vpop.permute.xlu1 %706  ;;  %v3619_v51 = vpop.permute.xlu0 %704 }
 0x1a0   : > { %930 = vrot.lane.b32.xlu0 %v571_v58, %s2921_s14  ;;  %934 = vrot.lane.b32.xlu1 %v572_v0, %s2921_s14  ;;  %v387_v58 = vmul.f32 %v3262_v43, %v3174_v25  ;;  %v389_v0 = vmul.f32 %v3276_v49, %v3148_v15  ;;  %v385_v25 = vmul.f32 %v3649_v29, %v3139_v8 }
 0x1a2   : > { %v3629_v32 = vpop.permute.xlu1 %698  ;;  %v3631_v55 = vpop.permute.xlu0 %708 }
 0x1a4   : > { %928 = vrot.lane.b32.xlu0 %v570_v12, %s2921_s14  ;;  %932 = vrot.lane.b32.xlu1 %v3365_v37, %s2921_s14  ;;  %v2928_v12 = vmov 0  }
 0x1a5   : > { %2756 = vset.pattern.permute.xlu0 %v2928_v12  ;;  %2757 = vset.pattern.permute.xlu1 %v2928_v12 }
 0x1a6   : > { %v3639_v28 = vpop.permute.xlu1 %702  ;;  %v3641_v41 = vpop.permute.xlu0 %700 }
 0x1a8   : > { %926 = vrot.lane.b32.xlu0 %v3353_v22, %s2921_s14  ;;  %924 = vrot.lane.b32.xlu1 %v569_v45, %s2921_s14  ;;  %v386_v45 = vmul.f32 %v3276_v49, %v3142_v9 }
 0x1aa   : > { %v3654_v13 = vpop.permute.xlu1 %680  ;;  %v3656_v37 = vpop.permute.xlu0 %678 }
 0x1ac   : > { %918 = vrot.lane.b32.xlu0 %v394_v38, %s2921_s14  ;;  %922 = vrot.lane.b32.xlu1 %v568_v33, %s2921_s14  ;;  %v384_v33 = vmul.f32 %v3262_v43, %v3168_v24 }
 0x1ae   : > { %v3665_v36 = vpop.permute.xlu1 %676  ;;  %v3667_v22 = vpop.permute.xlu0 %674 }
 0x1b0   : > { %916 = vrot.lane.b32.xlu0 %v393_v52, %s2921_s14  ;;  %920 = vrot.lane.b32.xlu1 %v395_v23, %s2921_s14  ;;  %v819_v52 = vsel %vm812_vm9, %v3425_v11, %v3421_v5  ;;  %v820_v23 = vsel %vm812_vm9, %v3421_v5, %v3439_v39 }
 0x1b2   : > { %v3675_v20 = vpop.permute.xlu1 %853  ;;  %v3677_v6 = vpop.permute.xlu0 %851 }
 0x1b4   : > { %914 = vrot.lane.b32.xlu0 %v392_v10, %s2921_s14  ;;  %912 = vrot.lane.b32.xlu1 %v391_v46, %s2921_s14  ;;  %v818_v46 = vsel %vm812_vm9, %v3451_v47, %v3447_v44 }
 0x1b6   : > { %v3685_v27 = vpop.permute.xlu1 %670  ;;  %v3687_v21 = vpop.permute.xlu0 %855 }
 0x1b8   : > { %906 = vrot.lane.b32.xlu0 %v388_v53, %s2921_s14  ;;  %910 = vrot.lane.b32.xlu1 %v390_v59, %s2921_s14  ;;  %v817_v53 = vsel %vm812_vm9, %v3433_v18, %v3451_v47  ;;  %v816_v47 = vsel %vm812_vm9, %v3457_v48, %v3476_v4 }
 0x1ba   : > { %v3695_v19 = vpop.permute.xlu1 %845  ;;  %v3697_v16 = vpop.permute.xlu0 %672 }
 0x1bc   : > { %904 = vrot.lane.b32.xlu0 %v387_v58, %s2921_s14  ;;  %908 = vrot.lane.b32.xlu1 %v389_v0, %s2921_s14  ;;  %v814_v0 = vsel %vm812_vm9, %v3487_v34, %v3485_v17  ;;  %v5096_v17 = vld [vmem:[#allocation32_spill] sm:$0xff] }
 0x1be   : > { %v3705_v14 = vpop.permute.xlu1 %849  ;;  %v3707_v26 = vpop.permute.xlu0 %847 }
 0x1c0   : > { %902 = vrot.lane.b32.xlu0 %v386_v45, %s2921_s14  ;;  %900 = vrot.lane.b32.xlu1 %v385_v25, %s2921_s14 }
 0x1c2   : > { %v3715_v15 = vpop.permute.xlu1 %666  ;;  %v3717_v38 = vpop.permute.xlu0 %668 }
 0x1c4   : > { %1086 = vrot.lane.b32.xlu0 %v819_v52, %s2921_s14  ;;  %898 = vrot.lane.b32.xlu1 %v384_v33, %s2921_s14  ;;  %v5097_v33 = vld [vmem:[#allocation29_spill] sm:$0xff] }
 0x1c5   : > { %v772_v52 = vsel %vm767_vm10, %v5097_v33, %v3557_v3 }
 0x1c6   : > { %v3726_v8 = vpop.permute.xlu1 %839  ;;  %v3728_v9 = vpop.permute.xlu0 %841 }
 0x1c8   : > { %1084 = vrot.lane.b32.xlu0 %v3425_v11, %s2921_s14  ;;  %1088 = vrot.lane.b32.xlu1 %v820_v23, %s2921_s14  ;;  %v815_v11 = vsel %vm812_vm9, %v3459_v56, %v3457_v48  ;;  %v5095_v48 = vld [vmem:[#allocation30_spill] sm:$0xff]  ;;  %v5098_v23 = vld [vmem:[#allocation31_spill] sm:$0xff] }
 0x1ca   : > { %v3736_v24 = vpop.permute.xlu1 %843  ;;  %v3738_v10 = vpop.permute.xlu0 %835 }
 0x1cc   : > { %1082 = vrot.lane.b32.xlu0 %v818_v46, %s2921_s14  ;;  %1080 = vrot.lane.b32.xlu1 %v817_v53, %s2921_s14  ;;  %v770_v53 = vsel %vm767_vm10, %v3565_v60, %v3563_v35 }
 0x1ce   : > { %v993_v5 = vpop.permute.xlu0 %992  ;;  %v3751_v39 = vpop.permute.xlu1 %833 }
 0x1d0   : > { %1074 = vrot.lane.b32.xlu0 %v815_v11, %s2921_s14  ;;  %1078 = vrot.lane.b32.xlu1 %v3433_v18, %s2921_s14  ;;  %v813_v18 = vsel %vm812_vm9, %v3474_v2, %v3487_v34  ;;  %v775_v34 = vsel %vm767_vm10, %v3555_v63, %v5096_v17 }
 0x1d2   : > { %v987_v44 = vpop.permute.xlu0 %986  ;;  %v3762_v59 = vpop.permute.xlu1 %837 }
 0x1d4   : > { %1076 = vrot.lane.b32.xlu1 %v816_v47, %s2921_s14  ;;  %1072 = vrot.lane.b32.xlu0 %v3459_v56, %s2921_s14  ;;  %v774_v56 = vsel %vm767_vm10, %v5095_v48, %v3555_v63 }
 0x1d6   : > { %v981_v58 = vpop.permute.xlu0 %980  ;;  %v969_v4 = vpop.permute.xlu1 %968 }
 0x1d8   : > { %1068 = vrot.lane.b32.xlu1 %v813_v18, %s2921_s14  ;;  %1070 = vrot.lane.b32.xlu0 %v814_v0, %s2921_s14  ;;  %v771_v18 = vsel %vm767_vm10, %v3563_v35, %v3573_v50  ;;  %v769_v35 = vsel %vm767_vm10, %v3581_v7, %v3579_v31 }
 0x1da   : > { %v975_v12 = vpop.permute.xlu0 %974  ;;  %v3784_v45 = vpop.permute.xlu1 %956 }
 0x1dc   : > { %1066 = vrot.lane.b32.xlu1 %v3474_v2, %s2921_s14  ;;  %1062 = vrot.lane.b32.xlu0 %v774_v56, %s2921_s14  ;;  %v773_v2 = vsel %vm767_vm10, %v3557_v3, %v5098_v23 }
 0x1de   : > { %v963_v25 = vpop.permute.xlu0 %962 }
 0x1e0   : > { %1064 = vrot.lane.b32.xlu1 %v775_v34, %s2921_s14  ;;  %1060 = vrot.lane.b32.xlu0 %v5095_v48, %s2921_s14  ;;  %v768_v34 = vsel %vm767_vm10, %v3571_v54, %v3581_v7 }
 0x1e4   : > { %1056 = vrot.lane.b32.xlu1 %v772_v52, %s2921_s14  ;;  %1058 = vrot.lane.b32.xlu0 %v773_v2, %s2921_s14  ;;  %v729_v52 = vsel %vm722_vm11, %v3588_v62, %v3586_v40 }
 0x1e6   : > { %v991_v63 = vpop.permute.xlu1 %990  ;;  %v989_v46 = vpop.permute.xlu0 %988 }
 0x1e7   : > { %v1145_v11 = vsel %vm305_vm1, %v991_v63, %v993_v5  ;;  %v1144_v47 = vsel %vm305_vm1, %v989_v46, %v991_v63 }
 0x1e8   : > { %1054 = vrot.lane.b32.xlu1 %v5097_v33, %s2921_s14  ;;  %1050 = vrot.lane.b32.xlu0 %v770_v53, %s2921_s14 }
 0x1e9   : > { %1271 = vmatprep.subr.mxu0 %v1145_v11  ;;  %v725_v11 = vsel %vm722_vm11, %v3619_v51, %v3617_v1 }
 0x1ea   : > { %1272 = vmatpush1.msra.mxu0 %v1144_v47  ;;  %v985_v3 = vpop.permute.xlu1 %984  ;;  %v983_v0 = vpop.permute.xlu0 %982 }
 0x1eb   : > { %v1143_v48 = vsel %vm305_vm1, %v985_v3, %v987_v44  ;;  %v1142_v56 = vsel %vm305_vm1, %v983_v0, %v985_v3  ;;  %v726_v0 = vsel %vm722_vm11, %v3617_v1, %v3631_v55 }
 0x1ec   : > { %1052 = vrot.lane.b32.xlu1 %v771_v18, %s2921_s14  ;;  %1048 = vrot.lane.b32.xlu0 %v3565_v60, %s2921_s14 }
 0x1ed   : > { %1273 = vmatprep.subr.mxu0 %v1143_v48  ;;  %v723_v48 = vsel %vm722_vm11, %v3629_v32, %v3641_v41 }
 0x1ee   : > { %1274 = vmatpush1.msra.mxu0 %v1142_v56  ;;  %v979_v5 = vpop.permute.xlu1 %978  ;;  %v977_v17 = vpop.permute.xlu0 %976  ;;  %v724_v56 = vsel %vm722_vm11, %v3641_v41, %v3639_v28 }
 0x1ef   : > { %v1141_v50 = vsel %vm305_vm1, %v979_v5, %v981_v58  ;;  %v1140_v44 = vsel %vm305_vm1, %v977_v17, %v979_v5  ;;  %v730_v58 = vsel %vm722_vm11, %v3586_v40, %v3599_v57  ;;  %v727_v40 = vsel %vm722_vm11, %v3597_v30, %v3609_v42 }
 0x1f0   : > { %1044 = vrot.lane.b32.xlu1 %v768_v34, %s2921_s14  ;;  %1046 = vrot.lane.b32.xlu0 %v769_v35, %s2921_s14  ;;  %v728_v57 = vsel %vm722_vm11, %v3609_v42, %v3607_v61  ;;  %v685_v5 = vsel %vm379_vm8, %v3656_v37, %v3654_v13 }
 0x1f1   : > { %1275 = vmatprep.subr.mxu0 %v1141_v50 }
 0x1f2   : > { %1276 = vmatpush1.msra.mxu0 %v1140_v44  ;;  %v973_v60 = vpop.permute.xlu1 %972  ;;  %v967_v33 = vpop.permute.xlu0 %966 }
 0x1f3   : > { %v1139_v23 = vsel %vm305_vm1, %v973_v60, %v975_v12  ;;  %v1137_v12 = vsel %vm305_vm1, %v967_v33, %v969_v4 }
 0x1f4   : > { %1042 = vrot.lane.b32.xlu1 %v3571_v54, %s2921_s14  ;;  %1038 = vrot.lane.b32.xlu0 %v729_v52, %s2921_s14  ;;  %v864_v52 = vsel %vm857_vm12, %v3677_v6, %v3675_v20 }
 0x1f5   : > { %1277 = vmatprep.subr.mxu0 %v1139_v23 }
 0x1f6   : > { %v971_v31 = vpop.permute.xlu1 %970  ;;  %v965_v7 = vpop.permute.xlu0 %964 }
 0x1f7   : > { %v1138_v2 = vsel %vm305_vm1, %v971_v31, %v973_v60  ;;  %v1136_v63 = vsel %vm305_vm1, %v965_v7, %v967_v33 }
 0x1f8   : > { %1040 = vrot.lane.b32.xlu1 %v730_v58, %s2921_s14  ;;  %1036 = vrot.lane.b32.xlu0 %v3588_v62, %s2921_s14 }
 0x1f9   : > { %1278 = vmatpush1.msra.mxu0 %v1138_v2  ;;  %v683_v2 = vsel %vm379_vm8, %v3685_v27, %v3697_v16 }
 0x1fa   : > { %1279 = vmatprep.subr.mxu0 %v1137_v12  ;;  %v961_v54 = vpop.permute.xlu1 %960  ;;  %v955_v46 = vpop.permute.xlu0 %954 }
 0x1fb   : > { %1280 = vmatpush1.msra.mxu0 %v1136_v63  ;;  %v1135_v53 = vsel %vm305_vm1, %v961_v54, %v963_v25  ;;  %v1133_v61 = vsel %vm305_vm1, %v955_v46, %v3784_v45  ;;  %v863_v63 = vsel %vm857_vm12, %v3707_v26, %v3705_v14  ;;  %v327_v14 = vld [vmem:[#allocation7 + $0x8] sm:$0xff] }
 0x1fc   : > { %1032 = vrot.lane.b32.xlu1 %v727_v40, %s2921_s14  ;;  %1034 = vrot.lane.b32.xlu0 %v728_v57, %s2921_s14 }
 0x1fd   : > { %1281 = vmatprep.subr.mxu0 %v1135_v53  ;;  %1335 = vmatprep.mubr.f32.mxu0 %v327_v14 }
 0x1fe   : > { %v959_v62 = vpop.permute.xlu1 %958  ;;  %v953_v4 = vpop.permute.xlu0 %952 }
 0x1ff   : > { %v1134_v47 = vsel %vm305_vm1, %v959_v62, %v961_v54  ;;  %v1132_v25 = vsel %vm305_vm1, %v953_v4, %v955_v46  ;;  %v682_v4 = vsel %vm379_vm8, %v3715_v15, %v3717_v38 }
 0x200   : > { %1030 = vrot.lane.b32.xlu1 %v3597_v30, %s2921_s14  ;;  %1026 = vrot.lane.b32.xlu0 %v725_v11, %s2921_s14 }
 0x201   : > { %1282 = vmatpush1.msra.mxu0 %v1134_v47 }
 0x202   : > { %1283 = vmatprep.subr.mxu0 %v1133_v61  ;;  %v949_v42 = vpop.permute.xlu1 %948  ;;  %v951_v3 = vpop.permute.xlu0 %950  ;;  %v860_v61 = vsel %vm857_vm12, %v3726_v8, %v3728_v9 }
 0x203   : > { %1284 = vmatpush1.msra.mxu0 %v1132_v25  ;;  %v1131_v18 = vsel %vm305_vm1, %v949_v42, %v951_v3 }
 0x204   : > { %1028 = vrot.lane.b32.xlu1 %v726_v0, %s2921_s14  ;;  %1024 = vrot.lane.b32.xlu0 %v3619_v51, %s2921_s14 }
 0x205   : > { %1285 = vmatprep.subr.mxu0 %v1131_v18  ;;  %v859_v18 = vsel %vm857_vm12, %v3738_v10, %v3762_v59 }
 0x206   : > { %v947_v30 = vpop.permute.xlu1 %946  ;;  %v943_v45 = vpop.permute.xlu0 %942 }
 0x207   : > { %v1130_v1 = vsel %vm305_vm1, %v947_v30, %v949_v42  ;;  %v858_v30 = vsel %vm857_vm12, %v3751_v39, %v3738_v10  ;;  %v340_v10 = vld [vmem:[%s5018_s3 + $0x10] sm:$0xff] }
 0x208   : > { %1020 = vrot.lane.b32.xlu1 %v723_v48, %s2921_s14  ;;  %1022 = vrot.lane.b32.xlu0 %v724_v56, %s2921_s14 }
 0x209   : > { %1286 = vmatpush1.msra.mxu0 %v1130_v1  ;;  %v338_v1 = vld [vmem:[%s5018_s3] sm:$0xff] }
 0x20a   : > { %v945_v55 = vpop.permute.xlu1 %944  ;;  %v941_v51 = vpop.permute.xlu0 %940 }
 0x20b   : > { %v1129_v17 = vsel %vm305_vm1, %v943_v45, %v945_v55  ;;  %v1128_v34 = vsel %vm305_vm1, %v941_v51, %v943_v45 }
 0x20c   : > { %1018 = vrot.lane.b32.xlu1 %v3629_v32, %s2921_s14  ;;  %1014 = vrot.lane.b32.xlu0 %v685_v5, %s2921_s14  ;;  %v684_v32 = vsel %vm379_vm8, %v3667_v22, %v3665_v36 }
 0x20d   : > { %1287 = vmatprep.subr.mxu0 %v1129_v17 }
 0x20e   : > { %1288 = vmatpush1.msra.mxu0 %v1128_v34  ;;  %v937_v28 = vpop.permute.xlu1 %936  ;;  %v939_v41 = vpop.permute.xlu0 %938 }
 0x20f   : > { %v1127_v35 = vsel %vm305_vm1, %v937_v28, %v939_v41 }
 0x210   : > { %1016 = vrot.lane.b32.xlu1 %v3654_v13, %s2921_s14  ;;  %1012 = vrot.lane.b32.xlu0 %v3656_v37, %s2921_s14  ;;  %v865_v37 = vsel %vm857_vm12, %v3675_v20, %v3687_v21 }
 0x211   : > { %1289 = vmatprep.subr.mxu0 %v1127_v35  ;;  %v3979_v35 = vld [vmem:[#allocation3 + $0x40] sm:$0xff] }
 0x212   : > { %v935_v50 = vpop.permute.xlu1 %934  ;;  %v931_v44 = vpop.permute.xlu0 %930 }
 0x213   : > { %v1126_v60 = vsel %vm305_vm1, %v935_v50, %v937_v28  ;;  %v3976_v28 = vld [vmem:[#allocation3 + $0x20] sm:$0xff] }
 0x214   : > { %1008 = vrot.lane.b32.xlu1 %v684_v32, %s2921_s14  ;;  %1010 = vrot.lane.b32.xlu0 %v3665_v36, %s2921_s14  ;;  %v5099_v32 = vld [vmem:[#allocation15_spill] sm:$0xff] }
 0x215   : > { %1290 = vmatpush1.msra.mxu0 %v1126_v60  ;;  %v1539_v60 = vmul.f32 %v3979_v35, %v5099_v32 }
 0x216   : > { %v933_v13 = vpop.permute.xlu1 %932  ;;  %v929_v33 = vpop.permute.xlu0 %928 }
 0x217   : > { %v1125_v23 = vsel %vm305_vm1, %v931_v44, %v933_v13  ;;  %v1124_v31 = vsel %vm305_vm1, %v929_v33, %v931_v44  ;;  %v3985_v13 = vld [vmem:[#allocation3] sm:$0xff] }
 0x218   : > { %1110 = vrot.lane.b32.xlu1 %v864_v52, %s2921_s14  ;;  %1112 = vrot.lane.b32.xlu0 %v865_v37, %s2921_s14 }
 0x219   : > { %1291 = vmatprep.subr.mxu0 %v1125_v23 }
 0x21a   : > { %1292 = vmatpush1.msra.mxu0 %v1124_v31  ;;  %v925_v36 = vpop.permute.xlu1 %924  ;;  %v927_v7 = vpop.permute.xlu0 %926  ;;  %v1533_v31 = vmul.f32 %v3985_v13, %v5099_v32 }
 0x21b   : > { %v1123_v58 = vsel %vm305_vm1, %v925_v36, %v927_v7  ;;  %v3995_v7 = vld [vmem:[#allocation3 + $0x60] sm:$0xff] }
 0x21c   : > { %1006 = vrot.lane.b32.xlu1 %v3667_v22, %s2921_s14  ;;  %1108 = vrot.lane.b32.xlu0 %v3677_v6, %s2921_s14  ;;  %v862_v6 = vsel %vm857_vm12, %v3695_v19, %v3707_v26 }
 0x21d   : > { %1293 = vmatprep.subr.mxu0 %v1123_v58 }
 0x21e   : > { %v923_v20 = vpop.permute.xlu1 %922  ;;  %v919_v21 = vpop.permute.xlu0 %918 }
 0x21f   : > { %v1122_v12 = vsel %vm305_vm1, %v923_v20, %v925_v36 }
 0x220   : > { %1002 = vrot.lane.b32.xlu1 %v683_v2, %s2921_s14  ;;  %1004 = vrot.lane.b32.xlu0 %v3697_v16, %s2921_s14  ;;  %v5100_v2 = vld [vmem:[#allocation14_spill] sm:$0xff] }
 0x221   : > { %1294 = vmatpush1.msra.mxu0 %v1122_v12  ;;  %v1527_v12 = vmul.f32 %v3979_v35, %v5100_v2  ;;  %v1530_v14 = vmul.f32 %v3995_v7, %v5100_v2 }
 0x222   : > { %v921_v54 = vpop.permute.xlu1 %920  ;;  %v917_v22 = vpop.permute.xlu0 %916 }
 0x223   : > { %v1121_v46 = vsel %vm305_vm1, %v919_v21, %v921_v54  ;;  %v1120_v40 = vsel %vm305_vm1, %v917_v22, %v919_v21  ;;  %v1542_v21 = vmul.f32 %v3995_v7, %v5099_v32 }
 0x224   : > { %1104 = vrot.lane.b32.xlu1 %v862_v6, %s2921_s14  ;;  %1106 = vrot.lane.b32.xlu0 %v863_v63, %s2921_s14  ;;  %v1536_v63 = vmul.f32 %v3976_v28, %v5099_v32 }
 0x225   : > { %1295 = vmatprep.subr.mxu0 %v1121_v46  ;;  %v1521_v46 = vmul.f32 %v3985_v13, %v5100_v2 }
 0x226   : > { %1296 = vmatpush1.msra.mxu0 %v1120_v40  ;;  %v913_v16 = vpop.permute.xlu1 %912  ;;  %v915_v57 = vpop.permute.xlu0 %914 }
 0x227   : > { %v1119_v53 = vsel %vm305_vm1, %v913_v16, %v915_v57 }
 0x228   : > { %1000 = vrot.lane.b32.xlu1 %v3685_v27, %s2921_s14  ;;  %1102 = vrot.lane.b32.xlu0 %v3695_v19, %s2921_s14  ;;  %v861_v19 = vsel %vm857_vm12, %v3728_v9, %v3736_v24 }
 0x229   : > { %1297 = vmatprep.subr.mxu0 %v1119_v53 }
 0x22a   : > { %v911_v26 = vpop.permute.xlu1 %910  ;;  %v907_v62 = vpop.permute.xlu0 %906 }
 0x22b   : > { %v1118_v11 = vsel %vm305_vm1, %v911_v26, %v913_v16  ;;  %v4017_v26 = vld [vmem:[#allocation3 + $0x58] sm:$0xff] }
 0x22c   : > { %996 = vrot.lane.b32.xlu1 %v682_v4, %s2921_s14  ;;  %998 = vrot.lane.b32.xlu0 %v3717_v38, %s2921_s14 }
 0x22d   : > { %1298 = vmatpush1.msra.mxu0 %v1118_v11 }
 0x22e   : > { %v909_v27 = vpop.permute.xlu1 %908  ;;  %v905_v47 = vpop.permute.xlu0 %904 }
 0x22f   : > { %v1117_v42 = vsel %vm305_vm1, %v907_v62, %v909_v27  ;;  %v1116_v25 = vsel %vm305_vm1, %v905_v47, %v907_v62  ;;  %v1524_v27 = vmul.f32 %v3976_v28, %v5100_v2  ;;  %v4025_v47 = vld [vmem:[#allocation3 + $0x18] sm:$0xff]  ;;  %v5103_v2 = vld [vmem:[#allocation23_spill] sm:$0xff] }
 0x230   : > { %1098 = vrot.lane.b32.xlu1 %v860_v61, %s2921_s14  ;;  %1100 = vrot.lane.b32.xlu0 %v861_v19, %s2921_s14 }
 0x231   : > { %1299 = vmatprep.subr.mxu0 %v1117_v42 }
 0x232   : > { %1300 = vmatpush1.msra.mxu0 %v1116_v25  ;;  %v901_v38 = vpop.permute.xlu1 %900  ;;  %v903_v3 = vpop.permute.xlu0 %902  ;;  %v5101_v25 = vld [vmem:[#allocation21_spill] sm:$0xff] }
 0x233   : > { %v1115_v0 = vsel %vm305_vm1, %v901_v38, %v903_v3 }
 0x234   : > { %994 = vrot.lane.b32.xlu1 %v3715_v15, %s2921_s14  ;;  %1096 = vrot.lane.b32.xlu0 %v3726_v8, %s2921_s14  ;;  %v341_v15 = vld [vmem:[%s5018_s3 + $0x18] sm:$0xff] }
 0x235   : > { %1301 = vmatprep.subr.mxu0 %v1115_v0 }
 0x236   : > { %v899_v9 = vpop.permute.xlu1 %898  ;;  %v1087_v24 = vpop.permute.xlu0 %1086 }
 0x237   : > { %v1114_v45 = vsel %vm305_vm1, %v899_v9, %v901_v38  ;;  %v1577_v38 = vmul.f32 %v4017_v26, %v5101_v25 }
 0x238   : > { %1092 = vrot.lane.b32.xlu1 %v858_v30, %s2921_s14  ;;  %1094 = vrot.lane.b32.xlu0 %v859_v18, %s2921_s14  ;;  %v1571_v18 = vmul.f32 %v4025_v47, %v5101_v25  ;;  %v1556_v30 = vld [vmem:[#allocation3 + $0x78] sm:$0xff] }
 0x239   : > { %1302 = vmatpush1.msra.mxu0 %v1114_v45 }
 0x23a   : > { %v1089_v8 = vpop.permute.xlu1 %1088  ;;  %v1085_v48 = vpop.permute.xlu0 %1084 }
 0x23b   : > { %v1177_v56 = vsel %vm305_vm1, %v1087_v24, %v1089_v8  ;;  %v1176_v59 = vsel %vm305_vm1, %v1085_v48, %v1087_v24  ;;  %v5102_v48 = vld [vmem:[#allocation19_spill] sm:$0xff] }
 0x23c   : > { %1090 = vrot.lane.b32.xlu1 %v3751_v39, %s2921_s14  ;;  %883 = vperm.xlu0 %2756, %v341_v15   ;;  %v339_v39 = vld [vmem:[%s5018_s3 + $0x8] sm:$0xff] }
 0x23d   : > { %1303 = vmatprep.subr.mxu0 %v1177_v56  ;;  %v1565_v56 = vmul.f32 %v4017_v26, %v5102_v48 }
 0x23e   : > { %1304 = vmatpush2.msra.mxu0 %v1176_v59  ;;  %v1081_v55 = vpop.permute.xlu1 %1080  ;;  %v1083_v51 = vpop.permute.xlu0 %1082  ;;  %v1550_v59 = vld [vmem:[#allocation3 + $0x38] sm:$0xff] }
 0x23f   : > { %v1175_v5 = vsel %vm305_vm1, %v1081_v55, %v1083_v51  ;;  %v1580_v51 = vmul.f32 %v1556_v30, %v5101_v25 }
 0x240   : > { %878 = vperm.xlu1 %2757, %v340_v10   ;;  %868 = vperm.xlu0 %2756, %v338_v1  }
 0x241   : > { %1305 = vmatprep.subr.mxu0 %v1175_v5  ;;  %v1559_v5 = vmul.f32 %v4025_v47, %v5102_v48 }
 0x242   : > { %v1079_v17 = vpop.permute.xlu1 %1078  ;;  %v1075_v34 = vpop.permute.xlu0 %1074 }
 0x243   : > { %v1174_v41 = vsel %vm305_vm1, %v1079_v17, %v1081_v55 }
 0x244   : > { %873 = vperm.xlu1 %2757, %v339_v39   ;;  %1611 = vrot.lane.b32.xlu0 %v3976_v28, %s2917_s15 }
 0x245   : > { %1306 = vmatpush2.msra.mxu0 %v1174_v41 }
 0x246   : > { %v1077_v50 = vpop.permute.xlu1 %1076  ;;  %v1073_v44 = vpop.permute.xlu0 %1072 }
 0x247   : > { %v1173_v33 = vsel %vm305_vm1, %v1075_v34, %v1077_v50  ;;  %v1172_v37 = vsel %vm305_vm1, %v1073_v44, %v1075_v34  ;;  %v1574_v50 = vmul.f32 %v1550_v59, %v5101_v25  ;;  %v1515_v44 = vmul.f32 %v3979_v35, %v3262_v43 }
 0x248   : > { %1605 = vrot.lane.b32.xlu1 %v3985_v13, %s2917_s15  ;;  %1705 = vrot.lane.b32.xlu0 %v1539_v60, %s2924_s26 }
 0x249   : > { %1307 = vmatprep.subr.mxu0 %v1173_v33 }
 0x24a   : > { %1308 = vmatpush2.msra.mxu0 %v1172_v37  ;;  %v1069_v52 = vpop.permute.xlu1 %1068  ;;  %v1071_v23 = vpop.permute.xlu0 %1070  ;;  %v1568_v37 = vmul.f32 %v1556_v30, %v5102_v48 }
 0x24b   : > { %v1171_v36 = vsel %vm305_vm1, %v1069_v52, %v1071_v23 }
 0x24c   : > { %1617 = vrot.lane.b32.xlu1 %v3979_v35, %s2917_s15  ;;  %1693 = vrot.lane.b32.xlu0 %v1533_v31, %s2924_s26 }
 0x24d   : > { %1309 = vmatprep.subr.mxu0 %v1171_v36  ;;  %v1562_v36 = vmul.f32 %v1550_v59, %v5102_v48 }
 0x24e   : > { %v1067_v58 = vpop.permute.xlu1 %1066  ;;  %v1063_v20 = vpop.permute.xlu0 %1062 }
 0x24f   : > { %v1170_v54 = vsel %vm305_vm1, %v1067_v58, %v1069_v52  ;;  %v1509_v52 = vmul.f32 %v3985_v13, %v3262_v43 }
 0x250   : > { %1711 = vrot.lane.b32.xlu1 %v1542_v21, %s2924_s26  ;;  %1661 = vrot.lane.b32.xlu0 %v1527_v12, %s2923_s18  ;;  %v1592_v12 = vmul.f32 %v1556_v30, %v5103_v2 }
 0x251   : > { %1310 = vmatpush2.msra.mxu0 %v1170_v54 }
 0x252   : > { %v1065_v22 = vpop.permute.xlu1 %1064  ;;  %v1061_v6 = vpop.permute.xlu0 %1060 }
 0x253   : > { %v1169_v40 = vsel %vm305_vm1, %v1063_v20, %v1065_v22  ;;  %v1168_v16 = vsel %vm305_vm1, %v1061_v6, %v1063_v20 }
 0x254   : > { %1699 = vrot.lane.b32.xlu1 %v1536_v63, %s2924_s26  ;;  %1649 = vrot.lane.b32.xlu0 %v1521_v46, %s2923_s18  ;;  %v1589_v63 = vmul.f32 %v4017_v26, %v5103_v2 }
 0x255   : > { %1311 = vmatprep.subr.mxu0 %v1169_v40 }
 0x256   : > { %1312 = vmatpush2.msra.mxu0 %v1168_v16  ;;  %v1057_v57 = vpop.permute.xlu1 %1056  ;;  %v1059_v53 = vpop.permute.xlu0 %1058 }
 0x257   : > { %v1167_v62 = vsel %vm305_vm1, %v1057_v57, %v1059_v53 }
 0x258   : > { %1667 = vrot.lane.b32.xlu1 %v1530_v14, %s2923_s18  ;;  %1861 = vrot.lane.b32.xlu0 %v4017_v26, %s2922_s20  ;;  %v1583_v26 = vmul.f32 %v4025_v47, %v5103_v2 }
 0x259   : > { %1313 = vmatprep.subr.mxu0 %v1167_v62 }
 0x25a   : > { %v1055_v4 = vpop.permute.xlu1 %1054  ;;  %v1051_v11 = vpop.permute.xlu0 %1050 }
 0x25b   : > { %v1166_v19 = vsel %vm305_vm1, %v1055_v4, %v1057_v57  ;;  %v1586_v57 = vmul.f32 %v1550_v59, %v5103_v2 }
 0x25c   : > { %1655 = vrot.lane.b32.xlu1 %v1524_v27, %s2923_s18  ;;  %1849 = vrot.lane.b32.xlu0 %v4025_v47, %s2922_s20  ;;  %v1512_v47 = vmul.f32 %v3976_v28, %v3262_v43 }
 0x25d   : > { %1314 = vmatpush2.msra.mxu0 %v1166_v19 }
 0x25e   : > { %v1053_v61 = vpop.permute.xlu1 %1052  ;;  %v1049_v42 = vpop.permute.xlu0 %1048 }
 0x25f   : > { %v1165_v3 = vsel %vm305_vm1, %v1051_v11, %v1053_v61  ;;  %v1164_v0 = vsel %vm305_vm1, %v1049_v42, %v1051_v11  ;;  %v1518_v61 = vmul.f32 %v3995_v7, %v3262_v43 }
 0x260   : > { %1623 = vrot.lane.b32.xlu1 %v3995_v7, %s2917_s15  ;;  %1817 = vrot.lane.b32.xlu0 %v1577_v38, %s2925_s11 }
 0x261   : > { %1315 = vmatprep.subr.mxu0 %v1165_v3 }
 0x262   : > { %1316 = vmatpush2.msra.mxu0 %v1164_v0  ;;  %v1045_v9 = vpop.permute.xlu1 %1044  ;;  %v1047_v24 = vpop.permute.xlu0 %1046 }
 0x263   : > { %v1163_v45 = vsel %vm305_vm1, %v1045_v9, %v1047_v24 }
 0x264   : > { %1867 = vrot.lane.b32.xlu1 %v1556_v30, %s2922_s20  ;;  %1805 = vrot.lane.b32.xlu0 %v1571_v18, %s2925_s11 }
 0x265   : > { %1317 = vmatprep.subr.mxu0 %v1163_v45 }
 0x266   : > { %v1043_v15 = vpop.permute.xlu1 %1042  ;;  %v1039_v8 = vpop.permute.xlu0 %1038 }
 0x267   : > { %v1162_v10 = vsel %vm305_vm1, %v1043_v15, %v1045_v9 }
 0x268   : > { %1855 = vrot.lane.b32.xlu1 %v1550_v59, %s2922_s20  ;;  %1773 = vrot.lane.b32.xlu0 %v1565_v56, %s2926_s8 }
 0x269   : > { %1318 = vmatpush2.msra.mxu0 %v1162_v10 }
 0x26a   : > { %v1041_v1 = vpop.permute.xlu1 %1040  ;;  %v1037_v55 = vpop.permute.xlu0 %1036 }
 0x26b   : > { %v1161_v39 = vsel %vm305_vm1, %v1039_v8, %v1041_v1  ;;  %v1160_v17 = vsel %vm305_vm1, %v1037_v55, %v1039_v8 }
 0x26c   : > { %1823 = vrot.lane.b32.xlu1 %v1580_v51, %s2925_s11  ;;  %1761 = vrot.lane.b32.xlu0 %v1559_v5, %s2926_s8 }
 0x26d   : > { %1319 = vmatprep.subr.mxu0 %v1161_v39  ;;  %v326_v39 = vld [vmem:[#allocation7] sm:$0xff] }
 0x26e   : > { %1320 = vmatpush2.msra.mxu0 %v1160_v17  ;;  %v1033_v34 = vpop.permute.xlu1 %1032  ;;  %v1035_v41 = vpop.permute.xlu0 %1034 }
 0x26f   : > { %v1159_v32 = vsel %vm305_vm1, %v1033_v34, %v1035_v41  ;;  %v330_v41 = vld [vmem:[#allocation7 + $0x20] sm:$0xff] }
 0x270   : > { %1811 = vrot.lane.b32.xlu1 %v1574_v50, %s2925_s11  ;;  %1965 = vrot.lane.b32.xlu0 %v1515_v44, %s2921_s14 }
 0x271   : > { %1321 = vmatprep.subr.mxu0 %v1159_v32  ;;  %v329_v32 = vld [vmem:[#allocation7 + $0x18] sm:$0xff] }
 0x272   : > { %v1031_v60 = vpop.permute.xlu1 %1030  ;;  %v1027_v33 = vpop.permute.xlu0 %1026 }
 0x273   : > { %v1158_v23 = vsel %vm305_vm1, %v1031_v60, %v1033_v34 }
 0x274   : > { %1779 = vrot.lane.b32.xlu1 %v1568_v37, %s2926_s8  ;;  %1953 = vrot.lane.b32.xlu0 %v1509_v52, %s2921_s14  ;;  %v332_v52 = vld [vmem:[#allocation7 + $0x30] sm:$0xff] }
 0x275   : > { %1322 = vmatpush2.msra.mxu0 %v1158_v23  ;;  %v328_v23 = vld [vmem:[#allocation7 + $0x10] sm:$0xff] }
 0x276   : > { %v1029_v35 = vpop.permute.xlu1 %1028  ;;  %v1025_v31 = vpop.permute.xlu0 %1024 }
 0x277   : > { %v1157_v58 = vsel %vm305_vm1, %v1027_v33, %v1029_v35  ;;  %v1156_v20 = vsel %vm305_vm1, %v1025_v31, %v1027_v33  ;;  %v333_v33 = vld [vmem:[#allocation7 + $0x38] sm:$0xff]  ;;  %v336_v31 = vld [vmem:[#allocation7 + $0x50] sm:$0xff] }
 0x278   : > { %1767 = vrot.lane.b32.xlu1 %v1562_v36, %s2926_s8  ;;  %1323 = vmatprep.subr.mxu0 %v1157_v58  ;;  %v5104_v36 = vmov 0.0   ;;  %v335_v58 = vld [vmem:[#allocation7 + $0x48] sm:$0xff] }
 0x279   : > { %1324 = vmatpush2.msra.mxu0 %v1156_v20  ;;  %v331_v20 = vld [vmem:[#allocation7 + $0x28] sm:$0xff] }
 0x27a   : > { %v1021_v13 = vpop.permute.xlu1 %1020  ;;  %v1023_v21 = vpop.permute.xlu0 %1022 }
 0x27b   : > { %v1155_v54 = vsel %vm305_vm1, %v1021_v13, %v1023_v21  ;;  %v337_v21 = vld [vmem:[#allocation7 + $0x58] sm:$0xff] }
 0x27c   : > { %1911 = vrot.lane.b32.xlu1 %v1592_v12, %s2927_s27  ;;  %1325 = vmatprep.subr.mxu0 %v1155_v54 }
 0x27e   : > { %v1019_v22 = vpop.permute.xlu1 %1018  ;;  %v1015_v6 = vpop.permute.xlu0 %1014 }
 0x27f   : > { %v1154_v46 = vsel %vm305_vm1, %v1019_v22, %v1021_v13  ;;  %v334_v13 = vld [vmem:[#allocation7 + $0x40] sm:$0xff] }
 0x280   : > { %1905 = vrot.lane.b32.xlu1 %v1589_v63, %s2927_s27  ;;  %1326 = vmatpush2.msra.mxu0 %v1154_v46 }
 0x282   : > { %v1017_v40 = vpop.permute.xlu1 %1016  ;;  %v1013_v16 = vpop.permute.xlu0 %1012 }
 0x283   : > { %v1153_v53 = vsel %vm305_vm1, %v1015_v6, %v1017_v40  ;;  %v1152_v14 = vsel %vm305_vm1, %v1013_v16, %v1015_v6 }
 0x284   : > { %1899 = vrot.lane.b32.xlu1 %v1586_v57, %s2927_s27  ;;  %1327 = vmatprep.subr.mxu0 %v1153_v53 }
 0x285   : > { %1328 = vmatpush2.msra.mxu0 %v1152_v14 }
 0x286   : > { %v1009_v62 = vpop.permute.xlu1 %1008  ;;  %v1011_v4 = vpop.permute.xlu0 %1010 }
 0x287   : > { %v1151_v11 = vsel %vm305_vm1, %v1009_v62, %v1011_v4 }
 0x288   : > { %1893 = vrot.lane.b32.xlu1 %v1583_v26, %s2927_s27  ;;  %1329 = vmatprep.subr.mxu0 %v1151_v11 }
 0x28a   : > { %v1111_v27 = vpop.permute.xlu1 %1110  ;;  %v1113_v19 = vpop.permute.xlu0 %1112 }
 0x28b   : > { %v1185_v42 = vsel %vm305_vm1, %v1111_v27, %v1113_v19 }
 0x28c   : > { %1971 = vrot.lane.b32.xlu1 %v1518_v61, %s2921_s14  ;;  %1384 = vmatprep.subr.mxu1 %v1185_v42 }
 0x28e   : > { %v1007_v25 = vpop.permute.xlu1 %1006  ;;  %v1109_v38 = vpop.permute.xlu0 %1108 }
 0x28f   : > { %v1150_v3 = vsel %vm305_vm1, %v1007_v25, %v1009_v62  ;;  %v1184_v0 = vsel %vm305_vm1, %v1109_v38, %v1111_v27 }
 0x290   : > { %1959 = vrot.lane.b32.xlu1 %v1512_v47, %s2921_s14  ;;  %1330 = vmatpush2.msra.mxu0 %v1150_v3 }
 0x291   : > { %1385 = vmatpush1.msra.mxu1 %v1184_v0 }
 0x292   : > { %v1003_v9 = vpop.permute.xlu1 %1002  ;;  %v1005_v7 = vpop.permute.xlu0 %1004 }
 0x293   : > { %v1149_v24 = vsel %vm305_vm1, %v1003_v9, %v1005_v7 }
 0x294   : > { %1331 = vmatprep.subr.mxu0 %v1149_v24 }
 0x296   : > { %v1105_v18 = vpop.permute.xlu1 %1104  ;;  %v1107_v30 = vpop.permute.xlu0 %1106 }
 0x297   : > { %v1183_v45 = vsel %vm305_vm1, %v1105_v18, %v1107_v30 }
 0x298   : > { %1386 = vmatprep.subr.mxu1 %v1183_v45 }
 0x29a   : > { %v1001_v15 = vpop.permute.xlu1 %1000  ;;  %v1103_v43 = vpop.permute.xlu0 %1102 }
 0x29b   : > { %v1148_v28 = vsel %vm305_vm1, %v1001_v15, %v1003_v9  ;;  %v1182_v8 = vsel %vm305_vm1, %v1103_v43, %v1105_v18 }
 0x29c   : > { %1332 = vmatpush2.msra.mxu0 %v1148_v28  ;;  %1387 = vmatpush1.msra.mxu1 %v1182_v8 }
 0x29e   : > { %v997_v48 = vpop.permute.xlu1 %996  ;;  %v999_v56 = vpop.permute.xlu0 %998 }
 0x29f   : > { %v1147_v59 = vsel %vm305_vm1, %v997_v48, %v999_v56 }
 0x2a0   : > { %1333 = vmatprep.subr.mxu0 %v1147_v59 }
 0x2a2   : > { %v1099_v10 = vpop.permute.xlu1 %1098  ;;  %v1101_v1 = vpop.permute.xlu0 %1100 }
 0x2a3   : > { %v1181_v55 = vsel %vm305_vm1, %v1099_v10, %v1101_v1 }
 0x2a4   : > { %1388 = vmatprep.subr.mxu1 %v1181_v55 }
 0x2a6   : > { %v995_v51 = vpop.permute.xlu1 %994  ;;  %v1097_v5 = vpop.permute.xlu0 %1096 }
 0x2a7   : > { %v1146_v17 = vsel %vm305_vm1, %v995_v51, %v997_v48  ;;  %v1180_v34 = vsel %vm305_vm1, %v1097_v5, %v1099_v10 }
 0x2a8   : > { %1334 = vmatpush2.msra.mxu0 %v1146_v17  ;;  %1389 = vmatpush1.msra.mxu1 %v1180_v34 }
 0x2a9   : > { %1336 = vmatmul.mubr.f32.vlgmr.msra.gmra.mxu0 %v326_v39 }
 0x2aa   : > { %v1093_v50 = vpop.permute.xlu1 %1092  ;;  %v1095_v44 = vpop.permute.xlu0 %1094  ;;  %1341 = vmatprep.mubr.f32.mxu0 %v330_v41 }
 0x2ab   : > { %v1179_v60 = vsel %vm305_vm1, %v1093_v50, %v1095_v44 }
 0x2ac   : > { %1390 = vmatprep.subr.mxu1 %v1179_v60 }
 0x2ad   : > { %1342 = vmatmul.mubr.f32.gmra.mxu0 %v329_v32 }
 0x2ae   : > { %v1091_v37 = vpop.permute.xlu1 %1090  ;;  %1347 = vmatprep.mubr.f32.mxu0 %v333_v33 }
 0x2af   : > { %v1178_v35 = vsel %vm305_vm1, %v1091_v37, %v1093_v50 }
 0x2b0   : > { %1391 = vmatpush1.msra.mxu1 %v1178_v35 }
 0x2b1   : > { %1348 = vmatmul.mubr.f32.gmra.mxu0 %v332_v52  ;;  %2646 = vmatmul.mubr.msk.f32.vlgmr.msra.gmra.mxu1 %vm1258_vm13, %v328_v23  ;;  %v5106_v52 = vld [vmem:[#allocation22_spill] sm:$0xff] }
 0x2b2   : > { %1353 = vmatprep.mubr.f32.mxu0 %v336_v31  ;;  %1430 = vmatprep.mubr.f32.mxu1 %v5104_v36  ;;  %v5107_v31 = vld [vmem:[#allocation24_spill] sm:$0xff] }
 0x2b5   : > { %1354 = vmatmul.mubr.f32.gmra.mxu0 %v335_v58  ;;  %2647 = vmatmul.mubr.msk.f32.gmra.mxu1 %vm1258_vm13, %v331_v20  ;;  %v5108_v20 = vld [vmem:[#allocation25_spill] sm:$0xff] }
 0x2b6   : > { %1436 = vmatprep.mubr.f32.mxu1 %v5104_v36  ;;  %2478 = vmatprep.mubr.f32.mxu0 %v5104_v36 }
 0x2b7   : > { %v884_v2 = vpop.permute.xlu0 %883 }
 0x2b9   : > { %2648 = vmatmul.mubr.msk.f32.gmra.mxu1 %vm1258_vm13, %v334_v13 }
 0x2ba   : > { %1442 = vmatprep.mubr.f32.mxu1 %v5104_v36 }
 0x2bb   : > { %v879_v54 = vpop.permute.xlu1 %878  ;;  %v869_v63 = vpop.permute.xlu0 %868 }
 0x2bd   : > { %2649 = vmatmul.mubr.msk.f32.gmra.mxu1 %vm1258_vm13, %v337_v21 }
 0x2bf   : > { %v874_v40 = vpop.permute.xlu1 %873 }
 0x2c3   : > { %v4120_v56 = vpop.permute.xlu1 %1605 }
 0x2c7   : > { %v4132_v60 = vpop.permute.xlu1 %1617 }
 0x2cb   : > { %v4145_v21 = vpop.permute.xlu1 %1711 }
 0x369   : > { %v1337_v12 = vpop.f32.mrf.mxu0 }
 0x36a   : > { %v1338_v16 = vadd.f32 %v1337_v12, %v869_v63 }
 0x36b   : > { %v1339_v22 = vpop.f32.mrf.mxu0 }
 0x36c   : > { %v1340_v14 = vadd.f32 %v1339_v22, %v869_v63  ;;  %v5111_v63 = vld [vmem:[#allocation18_spill] sm:$0xff] }
 0x36d   : > { %v1343_v6 = vpop.f32.mrf.mxu0 }
 0x36e   : > { %v1344_v62 = vadd.f32 %v1343_v6, %v874_v40  ;;  %v4154_v6 = vpop.permute.xlu1 %1699 }
 0x36f   : > { %v1345_v46 = vpop.f32.mrf.mxu0 }
 0x370   : > { %v1346_v27 = vadd.f32 %v1345_v46, %v874_v40  ;;  %v5112_v40 = vld [vmem:[#allocation17_spill] sm:$0xff] }
 0x371   : > { %v1349_v57 = vpop.f32.mrf.mxu0  ;;  %v1426_v53 = vpop.f32.mrf.mxu1 }
 0x372   : > { %v1427_v4 = vadd.f32 %v1426_v53, %v1338_v16  ;;  %v1350_v25 = vadd.f32 %v1349_v57, %v879_v54  ;;  %v4163_v53 = vpop.permute.xlu1 %1667 }
 0x373   : > { %v1351_v26 = vpop.f32.mrf.mxu0  ;;  %v1428_v11 = vpop.f32.mrf.mxu1 }
 0x374   : > { %v1449_v19 = vmul.f32 0.2, %v1427_v4  ;;  %v1429_v61 = vadd.f32 %v1428_v11, %v1340_v14  ;;  %v1352_v7 = vadd.f32 %v1351_v26, %v879_v54  ;;  %v5110_v54 = vld [vmem:[#allocation16_spill] sm:$0xff] }
 0x375   : > { %v1432_v42 = vpop.f32.mrf.mxu1  ;;  %v1355_v0 = vpop.f32.mrf.mxu0  ;;  %v5113_v14 = vld [vmem:[#allocation28_spill] sm:$0xff] }
 0x376   : > { %v1457_v38 = vmax.f32 %v1427_v4, %v1449_v19  ;;  %v1450_v47 = vmul.f32 0.2, %v1429_v61  ;;  %v1433_v3 = vadd.f32 %v1432_v42, %v1344_v62  ;;  %v1356_v59 = vadd.f32 %v1355_v0, %v884_v2  ;;  %v5114_v4 = vld [vmem:[#allocation26_spill] sm:$0xff]  ;;  %v4173_v11 = vpop.permute.xlu1 %1655 }
 0x377   : > { %v1434_v9 = vpop.f32.mrf.mxu1  ;;  %v1357_v8 = vpop.f32.mrf.mxu0 }
 0x378   : > { %v4113_v24 = vmax.f32 %v1429_v61, %v1450_v47  ;;  %v1451_v18 = vmul.f32 0.2, %v1433_v3  ;;  %v1435_v30 = vadd.f32 %v1434_v9, %v1346_v27  ;;  %1607 = vrot.lane.b32.xlu0 %v1457_v38, %s2917_s15  ;;  %v1358_v5 = vadd.f32 %v1357_v8, %v884_v2  ;;  %v5109_v2 = vld [vmem:[#allocation20_spill] sm:$0xff]  ;;  %v5115_v27 = vld [vmem:[#allocation27_spill] sm:$0xff]  ;;  %v4180_v61 = vpop.permute.xlu0 %1611 }
 0x379   : > { %v1438_v45 = vpop.f32.mrf.mxu1  ;;  %v1534_v23 = vmul.f32 %v1457_v38, %v5106_v52  ;;  %v1581_v58 = vmul.f32 %v1457_v38, %v5107_v31  ;;  %v1522_v13 = vmul.f32 %v1457_v38, %v5108_v20  ;;  %v1569_v12 = vmul.f32 %v1457_v38, %v5109_v2 }
 0x37a   : > { %v4116_v15 = vmax.f32 %v1433_v3, %v1451_v18  ;;  %v1452_v43 = vmul.f32 0.2, %v1435_v30  ;;  %v1439_v28 = vadd.f32 %v1438_v45, %v1350_v25  ;;  %1609 = vrot.lane.b32.xlu1 %v4113_v24, %s2917_s15  ;;  %v1535_v22 = vmul.f32 %v4113_v24, %v5110_v54  ;;  %v4183_v42 = vpop.permute.xlu1 %1623 }
 0x37b   : > { %v1440_v48 = vpop.f32.mrf.mxu1  ;;  %v1557_v46 = vmul.f32 %v1457_v38, %v5111_v63  ;;  %v1523_v16 = vmul.f32 %v4113_v24, %v5112_v40  ;;  %v1510_v57 = vmul.f32 %v1457_v38, %v3649_v29  ;;  %v1582_v62 = vmul.f32 %v4113_v24, %v5113_v14 }
 0x37c   : > { %v4122_v10 = vmax.f32 %v1435_v30, %v1452_v43  ;;  %v1453_v1 = vmul.f32 0.2, %v1439_v28  ;;  %v1441_v55 = vadd.f32 %v1440_v48, %v1352_v7  ;;  %1845 = vrot.lane.b32.xlu0 %v1457_v38, %s2922_s20  ;;  %v1570_v26 = vmul.f32 %v4113_v24, %v5114_v4  ;;  %v4189_v25 = vpop.permute.xlu0 %1705 }
 0x37d   : > { %v1444_v51 = vpop.f32.mrf.mxu1  ;;  %v1558_v19 = vmul.f32 %v4113_v24, %v5115_v27  ;;  %v1537_v3 = vmul.f32 %v4116_v15, %v5106_v52  ;;  %v1572_v45 = vmul.f32 %v4116_v15, %v5109_v2 }
 0x37e   : > { %v4125_v39 = vmax.f32 %v1439_v28, %v1453_v1  ;;  %v1454_v17 = vmul.f32 0.2, %v1441_v55  ;;  %v1445_v34 = vadd.f32 %v1444_v51, %v1356_v59  ;;  %1847 = vrot.lane.b32.xlu1 %v4113_v24, %s2922_s20  ;;  %v4195_v47 = vpop.permute.xlu1 %1867  ;;  %v1538_v9 = vmul.f32 %v4122_v10, %v5110_v54 }
 0x37f   : > { %v1446_v41 = vpop.f32.mrf.mxu1  ;;  %v1526_v18 = vmul.f32 %v4122_v10, %v5112_v40  ;;  %v1560_v28 = vmul.f32 %v4116_v15, %v5111_v63  ;;  %v1573_v48 = vmul.f32 %v4122_v10, %v5114_v4  ;;  %v1584_v1 = vmul.f32 %v4116_v15, %v5107_v31 }
 0x380   : > { %v4129_v50 = vmax.f32 %v1441_v55, %v1454_v17  ;;  %v1455_v44 = vmul.f32 0.2, %v1445_v34  ;;  %v1447_v32 = vadd.f32 %v1446_v41, %v1358_v5  ;;  %1725 = vrot.lane.b32.xlu0 %v1457_v38, %s5105_s10  ;;  %v1511_v38 = vmul.f32 %v4113_v24, %v3276_v49  ;;  %v4202_v0 = vpop.permute.xlu0 %1693 }
 0x381   : > { %v1561_v55 = vmul.f32 %v4122_v10, %v5115_v27  ;;  %v1513_v5 = vmul.f32 %v4116_v15, %v3649_v29 }
 0x382   : > { %v4134_v33 = vmax.f32 %v1445_v34, %v1455_v44  ;;  %v1456_v37 = vmul.f32 0.2, %v1447_v32  ;;  %1727 = vrot.lane.b32.xlu1 %v4113_v24, %s5105_s10  ;;  %v4207_v7 = vpop.permute.xlu1 %1855  ;;  %v1525_v24 = vmul.f32 %v4116_v15, %v5108_v20  ;;  %v1585_v34 = vmul.f32 %v4122_v10, %v5113_v14 }
 0x383   : > { %v1514_v44 = vmul.f32 %v4122_v10, %v3276_v49 }
 0x384   : > { %v4139_v35 = vmax.f32 %v1447_v32, %v1456_v37  ;;  %1695 = vrot.lane.b32.xlu0 %v1534_v23, %s2924_s26  ;;  %v4215_v30 = vpop.permute.xlu0 %1661  ;;  %v1587_v23 = vmul.f32 %v4125_v39, %v5107_v31 }
 0x386   : > { %1889 = vrot.lane.b32.xlu1 %v1581_v58, %s2927_s27  ;;  %v4220_v43 = vpop.permute.xlu1 %1823 }
 0x388   : > { %1651 = vrot.lane.b32.xlu0 %v1522_v13, %s2923_s18  ;;  %v4227_v8 = vpop.permute.xlu0 %1649  ;;  %v1541_v13 = vmul.f32 %v4129_v50, %v5110_v54 }
 0x38a   : > { %1613 = vrot.lane.b32.xlu1 %v4116_v15, %s2917_s15  ;;  %v4232_v59 = vpop.permute.xlu1 %1811 }
 0x38c   : > { %1801 = vrot.lane.b32.xlu0 %v1569_v12, %s2925_s11  ;;  %v4240_v51 = vpop.permute.xlu0 %1861 }
 0x38e   : > { %1697 = vrot.lane.b32.xlu1 %v1535_v22, %s2924_s26  ;;  %v4245_v17 = vpop.permute.xlu1 %1779 }
 0x390   : > { %1757 = vrot.lane.b32.xlu0 %v1557_v46, %s2926_s8  ;;  %v4251_v41 = vpop.permute.xlu0 %1849  ;;  %v1529_v46 = vmul.f32 %v4129_v50, %v5112_v40 }
 0x392   : > { %1653 = vrot.lane.b32.xlu1 %v1523_v16, %s2923_s18  ;;  %v4257_v32 = vpop.permute.xlu1 %1767  ;;  %v1575_v16 = vmul.f32 %v4125_v39, %v5109_v2 }
 0x394   : > { %1955 = vrot.lane.b32.xlu0 %v1510_v57, %s2921_s14  ;;  %v4264_v37 = vpop.permute.xlu0 %1817 }
 0x396   : > { %1851 = vrot.lane.b32.xlu1 %v4116_v15, %s2922_s20  ;;  %v4269_v58 = vpop.permute.xlu1 %1911 }
 0x398   : > { %1891 = vrot.lane.b32.xlu0 %v1582_v62, %s2927_s27  ;;  %v4277_v12 = vpop.permute.xlu0 %1805 }
 0x39a   : > { %1803 = vrot.lane.b32.xlu1 %v1570_v26, %s2925_s11  ;;  %v4280_v22 = vpop.permute.xlu1 %1905  ;;  %v1563_v26 = vmul.f32 %v4125_v39, %v5111_v63 }
 0x39c   : > { %1615 = vrot.lane.b32.xlu0 %v4122_v10, %s2917_s15  ;;  %v4289_v57 = vpop.permute.xlu0 %1773 }
 0x39e   : > { %1759 = vrot.lane.b32.xlu1 %v1558_v19, %s2926_s8  ;;  %v4292_v62 = vpop.permute.xlu1 %1899 }
 0x3a0   : > { %1853 = vrot.lane.b32.xlu0 %v4122_v10, %s2922_s20  ;;  %v4299_v19 = vpop.permute.xlu0 %1761 }
 0x3a2   : > { %1729 = vrot.lane.b32.xlu1 %v4116_v15, %s5105_s10  ;;  %v1540_v15 = vmul.f32 %v4125_v39, %v5106_v52 }
 0x3a4   : > { %1731 = vrot.lane.b32.xlu0 %v4122_v10, %s5105_s10  ;;  %v1528_v10 = vmul.f32 %v4125_v39, %v5108_v20 }
 0x3a6   : > { %1957 = vrot.lane.b32.xlu1 %v1511_v38, %s2921_s14  ;;  %v4303_v38 = vpop.permute.xlu1 %1893 }
 0x3a8   : > { %1619 = vrot.lane.b32.xlu0 %v4125_v39, %s2917_s15 }
 0x3aa   : > { %1701 = vrot.lane.b32.xlu1 %v1537_v3, %s2924_s26  ;;  %v1576_v3 = vmul.f32 %v4129_v50, %v5114_v4 }
 0x3ac   : > { %1703 = vrot.lane.b32.xlu0 %v1538_v9, %s2924_s26  ;;  %v1516_v9 = vmul.f32 %v4125_v39, %v3649_v29 }
 0x3ae   : > { %1657 = vrot.lane.b32.xlu1 %v1525_v24, %s2923_s18  ;;  %v4312_v24 = vpop.permute.xlu0 %1965 }
 0x3b0   : > { %1659 = vrot.lane.b32.xlu0 %v1526_v18, %s2923_s18  ;;  %v1564_v18 = vmul.f32 %v4129_v50, %v5115_v27 }
 0x3b2   : > { %1807 = vrot.lane.b32.xlu1 %v1572_v45, %s2925_s11  ;;  %v4317_v45 = vpop.permute.xlu1 %1971 }
 0x3b4   : > { %1857 = vrot.lane.b32.xlu0 %v4125_v39, %s2922_s20 }
 0x3b6   : > { %1763 = vrot.lane.b32.xlu1 %v1560_v28, %s2926_s8  ;;  %v1588_v28 = vmul.f32 %v4129_v50, %v5113_v14 }
 0x3b8   : > { %1809 = vrot.lane.b32.xlu0 %v1573_v48, %s2925_s11  ;;  %v4323_v48 = vpop.permute.xlu0 %1953 }
 0x3ba   : > { %1895 = vrot.lane.b32.xlu1 %v1584_v1, %s2927_s27  ;;  %v1517_v1 = vmul.f32 %v4129_v50, %v3276_v49 }
 0x3bc   : > { %1765 = vrot.lane.b32.xlu0 %v1561_v55, %s2926_s8 }
 0x3be   : > { %1961 = vrot.lane.b32.xlu1 %v1513_v5, %s2921_s14 }
 0x3c0   : > { %1897 = vrot.lane.b32.xlu0 %v1585_v34, %s2927_s27  ;;  %v1543_v34 = vmul.f32 %v4134_v33, %v5106_v52 }
 0x3c2   : > { %1733 = vrot.lane.b32.xlu1 %v4125_v39, %s5105_s10  ;;  %v4327_v39 = vpop.permute.xlu1 %1959 }
 0x3c4   : > { %1963 = vrot.lane.b32.xlu0 %v1514_v44, %s2921_s14 }
 0x3c6   : > { %1859 = vrot.lane.b32.xlu1 %v4129_v50, %s2922_s20 }
 0x3c8   : > { %1707 = vrot.lane.b32.xlu0 %v1540_v15, %s2924_s26 }
 0x3ca   : > { %1901 = vrot.lane.b32.xlu1 %v1587_v23, %s2927_s27 }
 0x3cc   : > { %1663 = vrot.lane.b32.xlu0 %v1528_v10, %s2923_s18  ;;  %v1544_v10 = vmul.f32 %v4139_v35, %v5110_v54  ;;  %v1566_v54 = vmul.f32 %v4134_v33, %v5111_v63  ;;  %v1567_v63 = vmul.f32 %v4139_v35, %v5115_v27 }
 0x3ce   : > { %1709 = vrot.lane.b32.xlu1 %v1541_v13, %s2924_s26  ;;  %v1578_v13 = vmul.f32 %v4134_v33, %v5109_v2  ;;  %v1579_v2 = vmul.f32 %v4139_v35, %v5114_v4  ;;  %v1519_v4 = vmul.f32 %v4134_v33, %v3649_v29 }
 0x3d0   : > { %1621 = vrot.lane.b32.xlu0 %v4129_v50, %s2917_s15 }
 0x3d2   : > { %1665 = vrot.lane.b32.xlu1 %v1529_v46, %s2923_s18 }
 0x3d4   : > { %1813 = vrot.lane.b32.xlu0 %v1575_v16, %s2925_s11 }
 0x3d6   : > { %1625 = vrot.lane.b32.xlu1 %v4134_v33, %s2917_s15 }
 0x3d8   : > { %1769 = vrot.lane.b32.xlu0 %v1563_v26, %s2926_s8 }
 0x3da   : > { %1863 = vrot.lane.b32.xlu1 %v4134_v33, %s2922_s20 }
 0x3dc   : > { %1735 = vrot.lane.b32.xlu0 %v4129_v50, %s5105_s10  ;;  %v1531_v50 = vmul.f32 %v4134_v33, %v5108_v20  ;;  %v1532_v20 = vmul.f32 %v4139_v35, %v5112_v40  ;;  %v1590_v40 = vmul.f32 %v4134_v33, %v5107_v31  ;;  %v1591_v31 = vmul.f32 %v4139_v35, %v5113_v14 }
 0x3de   : > { %1815 = vrot.lane.b32.xlu1 %v1576_v3, %s2925_s11 }
 0x3e0   : > { %1967 = vrot.lane.b32.xlu0 %v1516_v9, %s2921_s14 }
 0x3e2   : > { %1771 = vrot.lane.b32.xlu1 %v1564_v18, %s2926_s8 }
 0x3e4   : > { %1903 = vrot.lane.b32.xlu0 %v1588_v28, %s2927_s27 }
 0x3e6   : > { %1737 = vrot.lane.b32.xlu1 %v4134_v33, %s5105_s10 }
 0x3e8   : > { %1627 = vrot.lane.b32.xlu0 %v4139_v35, %s2917_s15  ;;  %s4972_s15 = scalar_lea.hbm %s5021_s6, %s2660_s29 }
 0x3ea   : > { %1969 = vrot.lane.b32.xlu1 %v1517_v1, %s2921_s14  ;;  %v4334_v55 = vpop.permute.xlu0 %1607 }
 0x3ec   : > { %v4336_v5 = vpop.permute.xlu1 %1609  ;;  %1865 = vrot.lane.b32.xlu0 %v4139_v35, %s2922_s20 }
 0x3ee   : > { %1713 = vrot.lane.b32.xlu1 %v1543_v34, %s2924_s26  ;;  %v4343_v44 = vpop.permute.xlu0 %1845  ;;  %v1520_v34 = vmul.f32 %v4139_v35, %v3276_v49  ;;  %v1629_v49 = vsel %vm441_vm2, %v4120_v56, %v4334_v55 }
 0x3f0   : > { %v4345_v15 = vpop.permute.xlu1 %1847  ;;  %1739 = vrot.lane.b32.xlu0 %v4139_v35, %s5105_s10 }
 0x3f1   : > { %v1870_v29 = vsel %vm812_vm9, %v4345_v15, %v4251_v41 }
 0x3f2   : > { %1669 = vrot.lane.b32.xlu1 %v1531_v50, %s2923_s18  ;;  %v4352_v23 = vpop.permute.xlu0 %1725 }
 0x3f4   : > { %v4356_v52 = vpop.permute.xlu1 %1727  ;;  %1715 = vrot.lane.b32.xlu0 %v1544_v10, %s2924_s26 }
 0x3f6   : > { %1819 = vrot.lane.b32.xlu1 %v1578_v13, %s2925_s11  ;;  %v1696_v46 = vpop.permute.xlu0 %1695 }
 0x3f7   : > { %v1717_v56 = vsel %vm657_vm6, %v4202_v0, %v1696_v46 }
 0x3f8   : > { %v4364_v16 = vpop.permute.xlu1 %1889  ;;  %1671 = vrot.lane.b32.xlu0 %v1532_v20, %s2923_s18  ;;  %s2842_s18 = sshll.u32 %s2929_s25, 4  ;;  %s2843_s18 = int_to_ptr.vmem [resolvable:$false] %s2842_s18 }
 0x3f9   : > { %s2844_s26 = scalar_lea.vmem %s2843_s18, 2048 }
 0x3fa   : > { %1775 = vrot.lane.b32.xlu1 %v1566_v54, %s2926_s8  ;;  %v4370_v26 = vpop.permute.xlu0 %1651 }
 0x3fc   : > { %v4374_v3 = vpop.permute.xlu1 %1613  ;;  %1821 = vrot.lane.b32.xlu0 %v1579_v2, %s2925_s11 }
 0x3fe   : > { %1907 = vrot.lane.b32.xlu1 %v1590_v40, %s2927_s27  ;;  %v4380_v9 = vpop.permute.xlu0 %1801  ;;  %v1631_v40 = vsel %vm441_vm2, %v4180_v61, %v4374_v3  ;;  %v1630_v61 = vsel %vm441_vm2, %v4334_v55, %v4336_v5 }
 0x400   : > { %v1698_v18 = vpop.permute.xlu1 %1697  ;;  %1777 = vrot.lane.b32.xlu0 %v1567_v63, %s2926_s8 }
 0x401   : > { %v1718_v20 = vsel %vm657_vm6, %v1696_v46, %v1698_v18 }
 0x402   : > { %1973 = vrot.lane.b32.xlu1 %v1519_v4, %s2921_s14  ;;  %v4388_v28 = vpop.permute.xlu0 %1757  ;;  %v1673_v4 = vsel %vm612_vm7, %v4227_v8, %v4370_v26  ;;  %v1869_v8 = vsel %vm812_vm9, %v4343_v44, %v4345_v15 }
 0x404   : > { %v1654_v1 = vpop.permute.xlu1 %1653  ;;  %1909 = vrot.lane.b32.xlu0 %v1591_v31, %s2927_s27 }
 0x406   : > { %1981 = vrot.lane.b32.xlu1 %v4336_v5, %s2921_s14  ;;  %v4395_v27 = vpop.permute.xlu0 %1955 }
 0x408   : > { %v1852_v50 = vpop.permute.xlu1 %1851  ;;  %1975 = vrot.lane.b32.xlu0 %v1520_v34, %s2921_s14 }
 0x40a   : > { %2125 = vrot.lane.b32.xlu1 %v1870_v29, %s2921_s14  ;;  %v4404_v33 = vpop.permute.xlu0 %1891 }
 0x40c   : > { %v1804_v14 = vpop.permute.xlu1 %1803  ;;  %2121 = vrot.lane.b32.xlu0 %v4343_v44, %s2921_s14  ;;  %v1674_v44 = vsel %vm612_vm7, %v4370_v26, %v1654_v1 }
 0x40d   : > { %v1826_v0 = vsel %vm767_vm10, %v1804_v14, %v4277_v12 }
 0x40e   : > { %2005 = vrot.lane.b32.xlu1 %v1654_v1, %s2921_s14  ;;  %v1616_v10 = vpop.permute.xlu0 %1615 }
 0x410   : > { %v4412_v35 = vpop.permute.xlu1 %1759  ;;  %1977 = vrot.lane.b32.xlu0 %v1629_v49, %s2921_s14 }
 0x412   : > { %2127 = vrot.lane.b32.xlu1 %v1852_v50, %s2921_s14  ;;  %v1854_v41 = vpop.permute.xlu0 %1853 }
 0x413   : > { %v1871_v26 = vsel %vm812_vm9, %v1852_v50, %v1854_v41 }
 0x414   : > { %v4416_v13 = vpop.permute.xlu1 %1729  ;;  %2097 = vrot.lane.b32.xlu0 %v4380_v9, %s2921_s14 }
 0x416   : > { %2027 = vrot.lane.b32.xlu1 %v1718_v20, %s2921_s14  ;;  %v4422_v54 = vpop.permute.xlu0 %1731 }
 0x418   : > { %v4426_v2 = vpop.permute.xlu1 %1957  ;;  %2025 = vrot.lane.b32.xlu0 %v1717_v56, %s2921_s14  ;;  %v1632_v56 = vsel %vm441_vm2, %v4374_v3, %v1616_v10 }
 0x41a   : > { %1983 = vrot.lane.b32.xlu1 %v1631_v40, %s2921_s14  ;;  %v4433_v63 = vpop.permute.xlu0 %1619 }
 0x41c   : > { %v1702_v31 = vpop.permute.xlu1 %1701  ;;  %2001 = vrot.lane.b32.xlu0 %v1673_v4, %s2921_s14 }
 0x41e   : > { %2101 = vrot.lane.b32.xlu1 %v1826_v0, %s2921_s14  ;;  %v1704_v46 = vpop.permute.xlu0 %1703 }
 0x41f   : > { %v1720_v3 = vsel %vm657_vm6, %v1702_v31, %v1704_v46 }
 0x420   : > { %v1658_v34 = vpop.permute.xlu1 %1657  ;;  %1979 = vrot.lane.b32.xlu0 %v1630_v61, %s2921_s14 }
 0x421   : > { %v1675_v55 = vsel %vm612_vm7, %v4173_v11, %v1658_v34  ;;  %v1825_v11 = vsel %vm767_vm10, %v4380_v9, %v1804_v14  ;;  %v1719_v9 = vsel %vm657_vm6, %v4154_v6, %v1702_v31 }
 0x422   : > { %v1660_v29 = vpop.permute.xlu0 %1659 }
 0x423   : > { %v1676_v50 = vsel %vm612_vm7, %v1658_v34, %v1660_v29 }
 0x424   : > { %v1808_v49 = vpop.permute.xlu1 %1807  ;;  %2123 = vrot.lane.b32.xlu0 %v1869_v8, %s2921_s14 }
 0x425   : > { %2103 = vrot.lane.b32.xlu1 %v1808_v49, %s2921_s14 }
 0x426   : > { %v4451_v12 = vpop.permute.xlu0 %1857 }
 0x428   : > { %v4453_v20 = vpop.permute.xlu1 %1763  ;;  %2029 = vrot.lane.b32.xlu0 %v1698_v18, %s2921_s14 }
 0x429   : > { %2007 = vrot.lane.b32.xlu1 %v1675_v55, %s2921_s14 }
 0x42a   : > { %v1810_v5 = vpop.permute.xlu0 %1809 }
 0x42b   : > { %v1827_v55 = vsel %vm767_vm10, %v1808_v49, %v1810_v5 }
 0x42c   : > { %v4461_v15 = vpop.permute.xlu1 %1895  ;;  %2003 = vrot.lane.b32.xlu0 %v1674_v44, %s2921_s14 }
 0x42d   : > { %1985 = vrot.lane.b32.xlu1 %v1632_v56, %s2921_s14 }
 0x42e   : > { %v4467_v40 = vpop.permute.xlu0 %1765 }
 0x430   : > { %v4471_v18 = vpop.permute.xlu1 %1961  ;;  %2099 = vrot.lane.b32.xlu0 %v1825_v11, %s2921_s14 }
 0x431   : > { %2129 = vrot.lane.b32.xlu1 %v1871_v26, %s2921_s14 }
 0x432   : > { %v4476_v1 = vpop.permute.xlu0 %1897 }
 0x434   : > { %v4478_v4 = vpop.permute.xlu1 %1733  ;;  %1987 = vrot.lane.b32.xlu0 %v1616_v10, %s2921_s14  ;;  %v1872_v10 = vsel %vm812_vm9, %v1854_v41, %v4207_v7 }
 0x435   : > { %2033 = vrot.lane.b32.xlu1 %v1720_v3, %s2921_s14 }
 0x436   : > { %v4483_v0 = vpop.permute.xlu0 %1963 }
 0x438   : > { %v1860_v14 = vpop.permute.xlu1 %1859  ;;  %2031 = vrot.lane.b32.xlu0 %v1719_v9, %s2921_s14 }
 0x439   : > { %2009 = vrot.lane.b32.xlu1 %v1676_v50, %s2921_s14  ;;  %v1874_v7 = vsel %vm812_vm9, %v1860_v14, %v4240_v51  ;;  %v1828_v51 = vsel %vm767_vm10, %v1810_v5, %v4232_v59 }
 0x43a   : > { %v1708_v61 = vpop.permute.xlu0 %1707 }
 0x43b   : > { %v1721_v59 = vsel %vm657_vm6, %v4189_v25, %v1708_v61 }
 0x43c   : > { %v4492_v8 = vpop.permute.xlu1 %1901  ;;  %2131 = vrot.lane.b32.xlu0 %v1872_v10, %s2921_s14 }
 0x43d   : > { %2105 = vrot.lane.b32.xlu1 %v1827_v55, %s2921_s14 }
 0x43e   : > { %v1664_v6 = vpop.permute.xlu0 %1663 }
 0x440   : > { %v1710_v31 = vpop.permute.xlu1 %1709  ;;  %2035 = vrot.lane.b32.xlu0 %v1704_v46, %s2921_s14  ;;  %v1633_v46 = vsel %vm441_vm2, %v4132_v60, %v4433_v63 }
 0x442   : > { %v1622_v44 = vpop.permute.xlu0 %1621 }
 0x443   : > { %1993 = vrot.lane.b32.xlu1 %v1622_v44, %s2921_s14  ;;  %v1634_v25 = vsel %vm441_vm2, %v4433_v63, %v1622_v44  ;;  %v1722_v63 = vsel %vm657_vm6, %v1708_v61, %v1710_v31 }
 0x444   : > { %v1666_v34 = vpop.permute.xlu1 %1665  ;;  %2011 = vrot.lane.b32.xlu0 %v1660_v29, %s2921_s14 }
 0x445   : > { %v1678_v9 = vsel %vm612_vm7, %v1664_v6, %v1666_v34 }
 0x446   : > { %v1814_v56 = vpop.permute.xlu0 %1813 }
 0x447   : > { %2137 = vrot.lane.b32.xlu1 %v1874_v7, %s2921_s14 }
 0x448   : > { %v1626_v41 = vpop.permute.xlu1 %1625  ;;  %2133 = vrot.lane.b32.xlu0 %v4451_v12, %s2921_s14 }
 0x449   : > { %v1635_v10 = vsel %vm441_vm2, %v4183_v42, %v1626_v41 }
 0x44a   : > { %v4505_v49 = vpop.permute.xlu0 %1769 }
 0x44b   : > { %2041 = vrot.lane.b32.xlu1 %v1710_v31, %s2921_s14 }
 0x44c   : > { %v1864_v11 = vpop.permute.xlu1 %1863  ;;  %1989 = vrot.lane.b32.xlu0 %v1633_v46, %s2921_s14  ;;  %v1677_v46 = vsel %vm612_vm7, %v4215_v30, %v1664_v6 }
 0x44e   : > { %v4512_v29 = vpop.permute.xlu0 %1735 }
 0x44f   : > { %2139 = vrot.lane.b32.xlu1 %v1864_v11, %s2921_s14 }
 0x450   : > { %v1816_v26 = vpop.permute.xlu1 %1815  ;;  %2107 = vrot.lane.b32.xlu0 %v1828_v51, %s2921_s14 }
 0x451   : > { %v1830_v7 = vsel %vm767_vm10, %v1816_v26, %v4264_v37  ;;  %v1873_v37 = vsel %vm812_vm9, %v4451_v12, %v1860_v14  ;;  %v1829_v12 = vsel %vm767_vm10, %v1814_v56, %v1816_v26 }
 0x452   : > { %v4518_v3 = vpop.permute.xlu0 %1967 }
 0x453   : > { %2015 = vrot.lane.b32.xlu1 %v1678_v9, %s2921_s14 }
 0x454   : > { %v4522_v60 = vpop.permute.xlu1 %1771  ;;  %2109 = vrot.lane.b32.xlu0 %v1814_v56, %s2921_s14 }
 0x456   : > { %v4525_v50 = vpop.permute.xlu0 %1903 }
 0x457   : > { %1995 = vrot.lane.b32.xlu1 %v1635_v10, %s2921_s14 }
 0x458   : > { %v4532_v5 = vpop.permute.xlu1 %1737  ;;  %2037 = vrot.lane.b32.xlu0 %v1721_v59, %s2921_s14 }
 0x45a   : > { %v1628_v55 = vpop.permute.xlu0 %1627 }
 0x45b   : > { %2113 = vrot.lane.b32.xlu1 %v1830_v7, %s2921_s14  ;;  %v1636_v61 = vsel %vm441_vm2, %v1626_v41, %v1628_v55 }
 0x45c   : > { %v4540_v51 = vpop.permute.xlu1 %1969  ;;  %2013 = vrot.lane.b32.xlu0 %v1677_v46, %s2921_s14 }
 0x45e   : > { %v1866_v42 = vpop.permute.xlu0 %1865 }
 0x460   : > { %v1714_v9 = vpop.permute.xlu1 %1713  ;;  %1991 = vrot.lane.b32.xlu0 %v1634_v25, %s2921_s14 }
 0x462   : > { %v4546_v10 = vpop.permute.xlu0 %1739 }
 0x464   : > { %v1670_v59 = vpop.permute.xlu1 %1669  ;;  %2135 = vrot.lane.b32.xlu0 %v1873_v37, %s2921_s14 }
 0x465   : > { %v1679_v56 = vsel %vm612_vm7, %v4163_v53, %v1670_v59 }
 0x466   : > { %v1716_v30 = vpop.permute.xlu0 %1715 }
 0x468   : > { %v1820_v6 = vpop.permute.xlu1 %1819  ;;  %2017 = vrot.lane.b32.xlu0 %v1666_v34, %s2921_s14  ;;  %v1723_v34 = vsel %vm657_vm6, %v4145_v21, %v1714_v9  ;;  %v1875_v21 = vsel %vm812_vm9, %v1864_v11, %v1866_v42 }
 0x469   : > { %2115 = vrot.lane.b32.xlu1 %v1820_v6, %s2921_s14 }
 0x46a   : > { %v1672_v7 = vpop.permute.xlu0 %1671 }
 0x46b   : > { %v1680_v11 = vsel %vm612_vm7, %v1670_v59, %v1672_v7 }
 0x46c   : > { %v1776_v44 = vpop.permute.xlu1 %1775  ;;  %2039 = vrot.lane.b32.xlu0 %v1722_v63, %s2921_s14 }
 0x46d   : > { %2091 = vrot.lane.b32.xlu1 %v1776_v44, %s2921_s14 }
 0x46e   : > { %v1822_v46 = vpop.permute.xlu0 %1821 }
 0x470   : > { %v4557_v14 = vpop.permute.xlu1 %1907  ;;  %2111 = vrot.lane.b32.xlu0 %v1829_v12, %s2921_s14  ;;  %v1876_v12 = vsel %vm812_vm9, %v1866_v42, %v4195_v47  ;;  %v1831_v47 = vsel %vm767_vm10, %v1820_v6, %v1822_v46 }
 0x471   : > { %2043 = vrot.lane.b32.xlu1 %v1723_v34, %s2921_s14 }
 0x472   : > { %v1778_v25 = vpop.permute.xlu0 %1777 }
 0x473   : > { %v1787_v59 = vsel %vm722_vm11, %v1776_v44, %v1778_v25  ;;  %v1788_v6 = vsel %vm722_vm11, %v1778_v25, %v4245_v17  ;;  %v1785_v44 = vsel %vm722_vm11, %v4505_v49, %v4522_v60  ;;  %v1783_v17 = vsel %vm722_vm11, %v4453_v20, %v4467_v40 }
 0x474   : > { %v4563_v37 = vpop.permute.xlu1 %1973  ;;  %1999 = vrot.lane.b32.xlu0 %v1628_v55, %s2921_s14  ;;  %v1724_v55 = vsel %vm657_vm6, %v1714_v9, %v1716_v30  ;;  %v1832_v9 = vsel %vm767_vm10, %v1822_v46, %v4220_v43  ;;  %v1786_v43 = vsel %vm722_vm11, %v4522_v60, %v4289_v57 }
 0x475   : > { %1997 = vrot.lane.b32.xlu1 %v1636_v61, %s2921_s14 }
 0x476   : > { %v4568_v31 = vpop.permute.xlu0 %1909 }
 0x478   : > { %v1982_v26 = vpop.permute.xlu1 %1981  ;;  %2019 = vrot.lane.b32.xlu0 %v1679_v56, %s2921_s14 }
 0x479   : > { %2141 = vrot.lane.b32.xlu1 %v1875_v21, %s2921_s14 }
 0x47a   : > { %v4575_v63 = vpop.permute.xlu0 %1975 }
 0x47c   : > { %v2126_v41 = vpop.permute.xlu1 %2125  ;;  %2143 = vrot.lane.b32.xlu0 %v1876_v12, %s2921_s14 }
 0x47d   : > { %2045 = vrot.lane.b32.xlu1 %v1724_v55, %s2921_s14 }
 0x47e   : > { %v4582_v53 = vpop.permute.xlu0 %2121 }
 0x480   : > { %v2006_v34 = vpop.permute.xlu1 %2005  ;;  %2047 = vrot.lane.b32.xlu0 %v1716_v30, %s2921_s14 }
 0x481   : > { %2021 = vrot.lane.b32.xlu1 %v1680_v11, %s2921_s14 }
 0x482   : > { %v4587_v61 = vpop.permute.xlu0 %1977 }
 0x484   : > { %v2128_v56 = vpop.permute.xlu1 %2127  ;;  %2023 = vrot.lane.b32.xlu0 %v1672_v7, %s2921_s14 }
 0x485   : > { %2117 = vrot.lane.b32.xlu1 %v1831_v47, %s2921_s14  ;;  %v1784_v47 = vsel %vm722_vm11, %v4467_v40, %v4257_v32  ;;  %v1744_v40 = vsel %vm379_vm8, %v4532_v5, %v4546_v10 }
 0x486   : > { %v4592_v42 = vpop.permute.xlu0 %2097 }
 0x487   : > { %5116 = vst [vmem:[#allocation30_spill] sm:$0xff] %v4592_v42 }
 0x488   : > { %v2028_v21 = vpop.permute.xlu1 %2027  ;;  %2119 = vrot.lane.b32.xlu0 %v1832_v9, %s2921_s14 }
 0x489   : > { %2093 = vrot.lane.b32.xlu1 %v1787_v59, %s2921_s14  ;;  %v1781_v59 = vsel %vm722_vm11, %v4388_v28, %v4412_v35 }
 0x48a   : > { %v2026_v30 = vpop.permute.xlu0 %2025 }
 0x48b   : > { %v4600_v12 = vsel %vm305_vm1, %v2026_v30, %v2028_v21 }
 0x48c   : > { %2095 = vrot.lane.b32.xlu0 %v1788_v6, %s2921_s14  ;;  %v1984_v7 = vpop.permute.xlu1 %1983 }
 0x48d   : > { %2089 = vrot.lane.b32.xlu1 %v1786_v43, %s2921_s14 }
 0x48e   : > { %v2002_v46 = vpop.permute.xlu0 %2001 }
 0x490   : > { %2087 = vrot.lane.b32.xlu0 %v1785_v44, %s2921_s14  ;;  %v2102_v55 = vpop.permute.xlu1 %2101 }
 0x491   : > { %2081 = vrot.lane.b32.xlu1 %v1783_v17, %s2921_s14 }
 0x492   : > { %v4617_v25 = vpop.permute.xlu0 %1979 }
 0x493   : > { %v4621_v57 = vsel %vm305_vm1, %v4617_v25, %v1982_v26 }
 0x494   : > { %2085 = vrot.lane.b32.xlu0 %v4505_v49, %s2921_s14  ;;  %v1782_v49 = vsel %vm722_vm11, %v4412_v35, %v4299_v19 }
 0x495   : > { %2079 = vrot.lane.b32.xlu1 %v4453_v20, %s2921_s14 }
 0x496   : > { %v4627_v60 = vpop.permute.xlu0 %2123 }
 0x497   : > { %v2104_v11 = vpop.permute.xlu1 %2103  ;;  %v4634_v9 = vsel %vm305_vm1, %v4627_v60, %v2126_v41 }
 0x498   : > { %2083 = vrot.lane.b32.xlu0 %v1784_v47, %s2921_s14 }
 0x499   : > { %2077 = vrot.lane.b32.xlu1 %v1782_v49, %s2921_s14 }
 0x49a   : > { %v2030_v20 = vpop.permute.xlu0 %2029 }
 0x49b   : > { %v2008_v26 = vpop.permute.xlu1 %2007  ;;  %v4645_v32 = vsel %vm305_vm1, %v2028_v21, %v2030_v20 }
 0x49c   : > { %2075 = vrot.lane.b32.xlu0 %v1781_v59, %s2921_s14 }
 0x49d   : > { %2069 = vrot.lane.b32.xlu1 %v1744_v40, %s2921_s14  ;;  %v1482_v40 = vld [vmem:[#allocation9 + $0x8] sm:$0xff] }
 0x49e   : > { %v2004_v19 = vpop.permute.xlu0 %2003  ;;  %2389 = vmatprep.mubr.f32.mxu1 %v1482_v40 }
 0x49f   : > { %v4653_v41 = vsel %vm305_vm1, %v2002_v46, %v2004_v19  ;;  %v1986_v30 = vpop.permute.xlu1 %1985  ;;  %v4656_v6 = vsel %vm305_vm1, %v2004_v19, %v2006_v34 }
 0x4a0   : > { %v4659_v35 = vsel %vm305_vm1, %v1984_v7, %v1986_v30  ;;  %2073 = vrot.lane.b32.xlu0 %v4388_v28, %s2921_s14 }
 0x4a1   : > { %2067 = vrot.lane.b32.xlu1 %v4532_v5, %s2921_s14  ;;  %v1743_v5 = vsel %vm379_vm8, %v4478_v4, %v4512_v29 }
 0x4a2   : > { %v4665_v21 = vpop.permute.xlu0 %2099 }
 0x4a3   : > { %5117 = vst [vmem:[#allocation32_spill] sm:$0xff] %v4665_v21  ;;  %v2130_v43 = vpop.permute.xlu1 %2129  ;;  %v4669_v46 = vsel %vm305_vm1, %v4665_v21, %v2102_v55 }
 0x4a4   : > { %5118 = vst [vmem:[#allocation29_spill] sm:$0xff] %v4669_v46  ;;  %v4672_v44 = vsel %vm305_vm1, %v2128_v56, %v2130_v43  ;;  %2071 = vrot.lane.b32.xlu0 %v4546_v10, %s2921_s14  ;;  %v1742_v56 = vsel %vm379_vm8, %v4416_v13, %v4422_v54 }
 0x4a5   : > { %2065 = vrot.lane.b32.xlu1 %v4512_v29, %s2921_s14 }
 0x4a6   : > { %v1988_v28 = vpop.permute.xlu0 %1987 }
 0x4a7   : > { %v2034_v34 = vpop.permute.xlu1 %2033  ;;  %v4682_v7 = vsel %vm305_vm1, %v1986_v30, %v1988_v28  ;;  %v1920_v28 = vsel %vm857_vm12, %v4568_v31, %v4269_v58  ;;  %v1915_v58 = vsel %vm857_vm12, %v4461_v15, %v4476_v1 }
 0x4a8   : > { %2063 = vrot.lane.b32.xlu0 %v1743_v5, %s2921_s14 }
 0x4a9   : > { %2057 = vrot.lane.b32.xlu1 %v1742_v56, %s2921_s14 }
 0x4aa   : > { %v2032_v10 = vpop.permute.xlu0 %2031 }
 0x4ab   : > { %v4690_v17 = vsel %vm305_vm1, %v2032_v10, %v2034_v34  ;;  %v2010_v55 = vpop.permute.xlu1 %2009  ;;  %v1916_v10 = vsel %vm857_vm12, %v4476_v1, %v4292_v62 }
 0x4ac   : > { %v4693_v47 = vsel %vm305_vm1, %v2008_v26, %v2010_v55  ;;  %2061 = vrot.lane.b32.xlu0 %v4478_v4, %s2921_s14 }
 0x4ad   : > { %2055 = vrot.lane.b32.xlu1 %v4416_v13, %s2921_s14  ;;  %v1741_v13 = vsel %vm379_vm8, %v4352_v23, %v4356_v52 }
 0x4ae   : > { %v2132_v29 = vpop.permute.xlu0 %2131 }
 0x4af   : > { %v2106_v49 = vpop.permute.xlu1 %2105  ;;  %v4700_v20 = vsel %vm305_vm1, %v2130_v43, %v2132_v29  ;;  %v1493_v29 = vld [vmem:[%s5020_s5] sm:$0xff] }
 0x4b0   : > { %v4703_v59 = vsel %vm305_vm1, %v2104_v11, %v2106_v49  ;;  %2059 = vrot.lane.b32.xlu0 %v4422_v54, %s2921_s14  ;;  %v1919_v11 = vsel %vm857_vm12, %v4557_v14, %v4568_v31 }
 0x4b1   : > { %5119 = vst [vmem:[#allocation31_spill] sm:$0xff] %v4703_v59  ;;  %2053 = vrot.lane.b32.xlu1 %v4356_v52, %s2921_s14 }
 0x4b2   : > { %v2036_v26 = vpop.permute.xlu0 %2035 }
 0x4b3   : > { %v4713_v4 = vsel %vm305_vm1, %v2034_v34, %v2036_v26  ;;  %v1918_v34 = vsel %vm857_vm12, %v4525_v50, %v4280_v22  ;;  %v1494_v26 = vld [vmem:[%s5020_s5 + $0x8] sm:$0xff] }
 0x4b4   : > { %2051 = vrot.lane.b32.xlu0 %v1741_v13, %s2921_s14 }
 0x4b5   : > { %v4719_v54 = vpop.permute.xlu1 %1993  ;;  %2165 = vrot.lane.b32.xlu1 %v1919_v11, %s2921_s14 }
 0x4b6   : > { %v2012_v19 = vpop.permute.xlu0 %2011 }
 0x4b7   : > { %v4723_v30 = vsel %vm305_vm1, %v2010_v55, %v2012_v19  ;;  %v1914_v55 = vsel %vm857_vm12, %v4404_v33, %v4303_v38  ;;  %v1495_v38 = vld [vmem:[%s5020_s5 + $0x10] sm:$0xff] }
 0x4b8   : > { %2049 = vrot.lane.b32.xlu0 %v4352_v23, %s2921_s14 }
 0x4b9   : > { %v4727_v52 = vpop.permute.xlu1 %2137  ;;  %2163 = vrot.lane.b32.xlu1 %v4557_v14, %s2921_s14  ;;  %v1917_v14 = vsel %vm857_vm12, %v4492_v8, %v4525_v50 }
 0x4ba   : > { %v4731_v43 = vpop.permute.xlu0 %2133 }
 0x4bc   : > { %2167 = vrot.lane.b32.xlu0 %v1920_v28, %s2921_s14 }
 0x4bd   : > { %2161 = vrot.lane.b32.xlu1 %v1918_v34, %s2921_s14  ;;  %v2042_v5 = vpop.permute.xlu1 %2041 }
 0x4be   : > { %v4741_v23 = vpop.permute.xlu0 %1989 }
 0x4c0   : > { %2159 = vrot.lane.b32.xlu0 %v1917_v14, %s2921_s14 }
 0x4c1   : > { %2153 = vrot.lane.b32.xlu1 %v1915_v58, %s2921_s14  ;;  %v4756_v56 = vpop.permute.xlu1 %2139 }
 0x4c2   : > { %v2108_v31 = vpop.permute.xlu0 %2107 }
 0x4c3   : > { %v4752_v22 = vsel %vm305_vm1, %v2106_v49, %v2108_v31  ;;  %v1913_v49 = vsel %vm857_vm12, %v4364_v16, %v4404_v33  ;;  %v1496_v33 = vld [vmem:[%s5020_s5 + $0x18] sm:$0xff] }
 0x4c4   : > { %2157 = vrot.lane.b32.xlu0 %v4492_v8, %s2921_s14 }
 0x4c5   : > { %2151 = vrot.lane.b32.xlu1 %v4461_v15, %s2921_s14  ;;  %v2016_v15 = vpop.permute.xlu1 %2015 }
 0x4c6   : > { %v4760_v50 = vpop.permute.xlu0 %2109 }
 0x4c8   : > { %2155 = vrot.lane.b32.xlu0 %v1916_v10, %s2921_s14 }
 0x4c9   : > { %2149 = vrot.lane.b32.xlu1 %v1914_v55, %s2921_s14  ;;  %v1996_v1 = vpop.permute.xlu1 %1995 }
 0x4ca   : > { %v2038_v8 = vpop.permute.xlu0 %2037 }
 0x4cc   : > { %2147 = vrot.lane.b32.xlu0 %v1913_v49, %s2921_s14 }
 0x4cd   : > { %1923 = vperm.xlu1 %2757, %v1493_v29   ;;  %v4790_v11 = vpop.permute.xlu1 %2113 }
 0x4ce   : > { %v2014_v62 = vpop.permute.xlu0 %2013 }
 0x4d0   : > { %2145 = vrot.lane.b32.xlu0 %v4364_v16, %s2921_s14  ;;  %s5127_s14 = sshll.u32 %s3094_s9, 6 }
 0x4d1   : > { %1933 = vperm.xlu1 %2757, %v1495_v38   ;;  %s298_s17 = scalar_lea.vmem [#allocation10], %s5127_s14 }
 0x4d2   : > { %v1992_v40 = vpop.permute.xlu0 %1991  ;;  %s2541_s12 = sshll.u32 %s298_s17, 4  ;;  %s4967_s12 = int_to_ptr.vmem [resolvable:$true] %s2541_s12 }
 0x4d3   : > { %s2838_s20 = scalar_lea.vmem %s4967_s12, 1024  ;;  %p2845_p6 = scmp.lt.s32.totalorder %s4967_s12, %s2843_s18 }
 0x4d4   : > { %1928 = vperm.xlu0 %2756, %v1494_v26   ;;  %p2839_p11 = scmp.ne.s32.totalorder %s4967_s12, %s2838_s20  ;;  %p2846_p12 = scmp.lt.s32.totalorder %s2844_s26, %s2838_s20 }
 0x4d6   : > { %v4788_v13 = vpop.permute.xlu0 %2135  ;;  %p2840_p1 = pnand %p2839_p11, %p5128_p10  ;;  %p2847_p7 = por %p2846_p12, %p2845_p6 }
 0x4d8   : > { %1938 = vperm.xlu0 %2756, %v1496_v33   ;;  %p2841_p2 = pneg %p2840_p1 }
 0x4da   : > { %v2018_v19 = vpop.permute.xlu0 %2017  ;;  %p2848_p9 = pnand %p2847_p7, %p2841_p2 }
 0x4db   : > { %v4792_v28 = vpop.permute.xlu1 %2115 }
 0x4de   : > { %v2040_v16 = vpop.permute.xlu0 %2039 }
 0x4df   : > { %v4794_v34 = vpop.permute.xlu1 %2091  ;;  %v2197_v42 = vsel %vm305_vm1, %v2038_v8, %v2040_v16 }
 0x4e0   : > { %5120 = vst [vmem:[#allocation15_spill] sm:$0xff] %v4794_v34  ;;  %v2198_v34 = vsel %vm305_vm1, %v2040_v16, %v2042_v5 }
 0x4e2   : > { %v4796_v14 = vpop.permute.xlu0 %2111 }
 0x4e3   : > { %v2044_v58 = vpop.permute.xlu1 %2043 }
 0x4e6   : > { %v2000_v31 = vpop.permute.xlu0 %1999 }
 0x4e7   : > { %v1998_v10 = vpop.permute.xlu1 %1997 }
 0x4e8   : > { %v2183_v8 = vsel %vm305_vm1, %v1996_v1, %v1998_v10 }
 0x4ea   : > { %v2020_v55 = vpop.permute.xlu0 %2019 }
 0x4eb   : > { %v4798_v29 = vpop.permute.xlu1 %2141 }
 0x4ee   : > { %v4800_v49 = vpop.permute.xlu0 %2143 }
 0x4ef   : > { %v2046_v38 = vpop.permute.xlu1 %2045 }
 0x4f0   : > { %v2199_v46 = vsel %vm305_vm1, %v2044_v58, %v2046_v38 }
 0x4f2   : > { %v2048_v26 = vpop.permute.xlu0 %2047 }
 0x4f3   : > { %v2022_v36 = vpop.permute.xlu1 %2021  ;;  %v2200_v33 = vsel %vm305_vm1, %v2046_v38, %v2048_v26 }
 0x4f4   : > { %2325 = vmatprep.subr.mxu1 %v2200_v33  ;;  %v2191_v5 = vsel %vm305_vm1, %v2020_v55, %v2022_v36 }
 0x4f5   : > { %2326 = vmatpush1.msra.mxu1 %v2199_v46 }
 0x4f6   : > { %2327 = vmatprep.subr.mxu1 %v2198_v34  ;;  %v2024_v21 = vpop.permute.xlu0 %2023  ;;  %v5125_v34 = vld [vmem:[#allocation15_spill] sm:$0xff] }
 0x4f7   : > { %v4806_v59 = vpop.permute.xlu1 %2117  ;;  %2328 = vmatpush1.msra.mxu1 %v2197_v42  ;;  %v2192_v46 = vsel %vm305_vm1, %v2022_v36, %v2024_v21  ;;  %v2190_v42 = vsel %vm305_vm1, %v2016_v15, %v2018_v19  ;;  %v2184_v21 = vsel %vm305_vm1, %v1998_v10, %v2000_v31 }
 0x4f8   : > { %2329 = vmatprep.subr.mxu1 %v4713_v4  ;;  %v2189_v4 = vsel %vm305_vm1, %v2014_v62, %v2016_v15  ;;  %v2182_v15 = vsel %vm305_vm1, %v1992_v40, %v4719_v54 }
 0x4f9   : > { %2330 = vmatpush1.msra.mxu1 %v4690_v17 }
 0x4fa   : > { %2331 = vmatprep.subr.mxu1 %v4645_v32  ;;  %v4811_v26 = vpop.permute.xlu0 %2119 }
 0x4fb   : > { %v4813_v58 = vpop.permute.xlu1 %2093  ;;  %2332 = vmatpush1.msra.mxu1 %v4600_v12 }
 0x4fc   : > { %2333 = vmatprep.subr.mxu1 %v2192_v46 }
 0x4fd   : > { %2334 = vmatpush1.msra.mxu1 %v2191_v5 }
 0x4fe   : > { %2335 = vmatprep.subr.mxu1 %v2190_v42  ;;  %v4820_v17 = vpop.permute.xlu0 %2095 }
 0x4ff   : > { %v4822_v32 = vpop.permute.xlu1 %2089  ;;  %2336 = vmatpush1.msra.mxu1 %v2189_v4 }
 0x500   : > { %2337 = vmatprep.subr.mxu1 %v4723_v30 }
 0x501   : > { %2338 = vmatpush1.msra.mxu1 %v4693_v47  ;;  %v2181_v47 = vsel %vm305_vm1, %v4741_v23, %v1992_v40  ;;  %v2176_v23 = vsel %vm305_vm1, %v4563_v37, %v4575_v63  ;;  %v2223_v40 = vsel %vm305_vm1, %v4792_v28, %v4806_v59  ;;  %v5124_v28 = vld [vmem:[#allocation29_spill] sm:$0xff] }
 0x502   : > { %2339 = vmatprep.subr.mxu1 %v4656_v6  ;;  %v4827_v12 = vpop.permute.xlu0 %2087 }
 0x503   : > { %v4829_v36 = vpop.permute.xlu1 %2081  ;;  %2340 = vmatpush1.msra.mxu1 %v4653_v41  ;;  %v2177_v41 = vsel %vm305_vm1, %v4587_v61, %v4617_v25  ;;  %v2174_v61 = vsel %vm305_vm1, %v4518_v3, %v4540_v51  ;;  %v2170_v51 = vsel %vm305_vm1, %v4395_v27, %v4426_v2  ;;  %v2230_v2 = vsel %vm305_vm1, %v4788_v13, %v4727_v52 }
 0x504   : > { %2341 = vmatprep.subr.mxu1 %v2184_v21 }
 0x505   : > { %2342 = vmatpush1.msra.mxu1 %v2183_v8 }
 0x506   : > { %2343 = vmatprep.subr.mxu1 %v2182_v15  ;;  %v4838_v6 = vpop.permute.xlu0 %2085 }
 0x507   : > { %v4840_v30 = vpop.permute.xlu1 %2079  ;;  %2344 = vmatpush1.msra.mxu1 %v2181_v47  ;;  %v2213_v31 = vsel %vm305_vm1, %v4838_v6, %v4827_v12  ;;  %v1481_v47 = vld [vmem:[#allocation9] sm:$0xff] }
 0x508   : > { %2345 = vmatprep.subr.mxu1 %v4682_v7  ;;  %v2175_v7 = vsel %vm305_vm1, %v4317_v45, %v4563_v37  ;;  %v2172_v45 = vsel %vm305_vm1, %v4471_v18, %v4483_v0  ;;  %v2171_v37 = vsel %vm305_vm1, %v4327_v39, %v4471_v18  ;;  %v2232_v0 = vsel %vm305_vm1, %v4798_v29, %v4800_v49 }
 0x509   : > { %2346 = vmatpush1.msra.mxu1 %v4659_v35  ;;  %v2231_v39 = vsel %vm305_vm1, %v4756_v56, %v4798_v29  ;;  %v2225_v56 = vsel %vm305_vm1, %v4582_v53, %v4627_v60  ;;  %v2221_v53 = vsel %vm305_vm1, %v4760_v50, %v4796_v14  ;;  %v2216_v50 = vsel %vm305_vm1, %v4813_v58, %v4820_v17 }
 0x50a   : > { %2347 = vmatprep.subr.mxu1 %v4621_v57  ;;  %v4848_v54 = vpop.permute.xlu0 %2083  ;;  %v2173_v57 = vsel %vm305_vm1, %v4312_v24, %v4518_v3  ;;  %v2169_v24 = vsel %vm305_vm1, %v4323_v48, %v4395_v27  ;;  %v2229_v48 = vsel %vm305_vm1, %v4731_v43, %v4788_v13  ;;  %v2224_v43 = vsel %vm305_vm1, %v4806_v59, %v4811_v26  ;;  %v5122_v13 = vld [vmem:[#allocation32_spill] sm:$0xff]  ;;  %v5123_v59 = vld [vmem:[#allocation30_spill] sm:$0xff] }
 0x50b   : > { %v4850_v62 = vpop.permute.xlu1 %2077  ;;  %2348 = vmatpush1.msra.mxu1 %v2177_v41  ;;  %v2217_v19 = vsel %vm305_vm1, %v5123_v59, %v5122_v13  ;;  %v2212_v29 = vsel %vm305_vm1, %v4829_v36, %v4848_v54  ;;  %v2211_v49 = vsel %vm305_vm1, %v4840_v30, %v4829_v36 }
 0x50c   : > { %2349 = vmatprep.subr.mxu1 %v2176_v23  ;;  %v1484_v23 = vld [vmem:[#allocation9 + $0x18] sm:$0xff] }
 0x50d   : > { %2350 = vmatpush1.msra.mxu1 %v2175_v7 }
 0x50e   : > { %2351 = vmatprep.subr.mxu1 %v2174_v61  ;;  %v4861_v25 = vpop.permute.xlu0 %2075  ;;  %v1488_v61 = vld [vmem:[#allocation9 + $0x38] sm:$0xff] }
 0x50f   : > { %v4866_v35 = vpop.permute.xlu1 %2069  ;;  %2352 = vmatpush1.msra.mxu1 %v2173_v57  ;;  %v2210_v38 = vsel %vm305_vm1, %v4861_v25, %v4850_v62  ;;  %v1485_v62 = vld [vmem:[#allocation9 + $0x20] sm:$0xff] }
 0x510   : > { %2353 = vmatprep.subr.mxu1 %v2172_v45 }
 0x511   : > { %2354 = vmatpush1.msra.mxu1 %v2171_v37 }
 0x512   : > { %2355 = vmatprep.subr.mxu1 %v2170_v51  ;;  %v2074_v63 = vpop.permute.xlu0 %2073  ;;  %v1491_v51 = vld [vmem:[#allocation9 + $0x50] sm:$0xff] }
 0x513   : > { %v2068_v3 = vpop.permute.xlu1 %2067  ;;  %2356 = vmatpush1.msra.mxu1 %v2169_v24  ;;  %v2209_v33 = vsel %vm305_vm1, %v2074_v63, %v4861_v25  ;;  %v1490_v24 = vld [vmem:[#allocation9 + $0x48] sm:$0xff] }
 0x514   : > { %2357 = vmatprep.subr.mxu1 %v2232_v0  ;;  %v2207_v5 = vsel %vm305_vm1, %v2068_v3, %v4866_v35 }
 0x515   : > { %2358 = vmatpush2.msra.mxu1 %v2231_v39 }
 0x516   : > { %2359 = vmatprep.subr.mxu1 %v2230_v2  ;;  %v2072_v27 = vpop.permute.xlu0 %2071  ;;  %v5126_v2 = vmov 0.0  }
 0x517   : > { %v2066_v18 = vpop.permute.xlu1 %2065  ;;  %2360 = vmatpush2.msra.mxu1 %v2229_v48  ;;  %v2208_v46 = vsel %vm305_vm1, %v4866_v35, %v2072_v27  ;;  %v1487_v35 = vld [vmem:[#allocation9 + $0x30] sm:$0xff] }
 0x518   : > { %2361 = vmatprep.subr.mxu1 %v4700_v20  ;;  %v5121_v20 = vld [vmem:[#allocation31_spill] sm:$0xff]  ;;  %v1483_v27 = vld [vmem:[#allocation9 + $0x10] sm:$0xff] }
 0x519   : > { %2362 = vmatpush2.msra.mxu1 %v4672_v44  ;;  %v2222_v44 = vsel %vm305_vm1, %v4796_v14, %v4790_v11  ;;  %v2215_v14 = vsel %vm305_vm1, %v5125_v34, %v4813_v58 }
 0x51a   : > { %2363 = vmatprep.subr.mxu1 %v4634_v9  ;;  %v2064_v1 = vpop.permute.xlu0 %2063 }
 0x51b   : > { %v2058_v52 = vpop.permute.xlu1 %2057  ;;  %2364 = vmatpush2.msra.mxu1 %v2225_v56  ;;  %v2206_v42 = vsel %vm305_vm1, %v2064_v1, %v2066_v18  ;;  %v1492_v18 = vld [vmem:[#allocation9 + $0x58] sm:$0xff] }
 0x51c   : > { %2365 = vmatprep.subr.mxu1 %v2224_v43 }
 0x51d   : > { %2366 = vmatpush2.msra.mxu1 %v2223_v40 }
 0x51e   : > { %2367 = vmatprep.subr.mxu1 %v2222_v44  ;;  %v2062_v60 = vpop.permute.xlu0 %2061 }
 0x51f   : > { %v2056_v9 = vpop.permute.xlu1 %2055  ;;  %2368 = vmatpush2.msra.mxu1 %v2221_v53  ;;  %v2205_v4 = vsel %vm305_vm1, %v2062_v60, %v2064_v1  ;;  %v1486_v1 = vld [vmem:[#allocation9 + $0x28] sm:$0xff] }
 0x520   : > { %2369 = vmatprep.subr.mxu1 %v4752_v22  ;;  %v2214_v22 = vsel %vm305_vm1, %v4827_v12, %v4822_v32  ;;  %v2203_v21 = vsel %vm305_vm1, %v2056_v9, %v2058_v52 }
 0x521   : > { %2370 = vmatpush2.msra.mxu1 %v5121_v20 }
 0x522   : > { %2371 = vmatprep.subr.mxu1 %v5124_v28  ;;  %v2060_v16 = vpop.permute.xlu0 %2059 }
 0x523   : > { %v2054_v11 = vpop.permute.xlu1 %2053  ;;  %2372 = vmatpush2.msra.mxu1 %v2217_v19  ;;  %v2204_v12 = vsel %vm305_vm1, %v2058_v52, %v2060_v16  ;;  %v1489_v52 = vld [vmem:[#allocation9 + $0x40] sm:$0xff] }
 0x524   : > { %2373 = vmatprep.subr.mxu1 %v2216_v50 }
 0x525   : > { %2374 = vmatpush2.msra.mxu1 %v2215_v14 }
 0x526   : > { %2375 = vmatprep.subr.mxu1 %v2214_v22  ;;  %v2052_v10 = vpop.permute.xlu0 %2051 }
 0x527   : > { %v2166_v55 = vpop.permute.xlu1 %2165  ;;  %2376 = vmatpush2.msra.mxu1 %v2213_v31  ;;  %v2202_v15 = vsel %vm305_vm1, %v2052_v10, %v2054_v11 }
 0x528   : > { %2377 = vmatprep.subr.mxu1 %v2212_v29 }
 0x529   : > { %2378 = vmatpush2.msra.mxu1 %v2211_v49 }
 0x52a   : > { %2379 = vmatprep.subr.mxu1 %v2210_v38  ;;  %v2050_v26 = vpop.permute.xlu0 %2049 }
 0x52b   : > { %v2164_v58 = vpop.permute.xlu1 %2163  ;;  %2380 = vmatpush2.msra.mxu1 %v2209_v33  ;;  %v2201_v6 = vsel %vm305_vm1, %v2050_v26, %v2052_v10 }
 0x52c   : > { %2381 = vmatprep.subr.mxu1 %v2208_v46  ;;  %v2239_v8 = vsel %vm305_vm1, %v2164_v58, %v2166_v55 }
 0x52d   : > { %2382 = vmatpush2.msra.mxu1 %v2207_v5 }
 0x52e   : > { %2383 = vmatprep.subr.mxu1 %v2206_v42  ;;  %v2168_v17 = vpop.permute.xlu0 %2167 }
 0x52f   : > { %v2162_v32 = vpop.permute.xlu1 %2161  ;;  %2384 = vmatpush2.msra.mxu1 %v2205_v4  ;;  %v2240_v36 = vsel %vm305_vm1, %v2166_v55, %v2168_v17 }
 0x530   : > { %2385 = vmatprep.subr.mxu1 %v2204_v12  ;;  %2438 = vmatprep.subr.mxu0 %v2240_v36 }
 0x531   : > { %2386 = vmatpush2.msra.mxu1 %v2203_v21  ;;  %2439 = vmatpush1.msra.mxu0 %v2239_v8 }
 0x532   : > { %2387 = vmatprep.subr.mxu1 %v2202_v15  ;;  %v2160_v30 = vpop.permute.xlu0 %2159 }
 0x533   : > { %v2154_v41 = vpop.permute.xlu1 %2153  ;;  %2388 = vmatpush2.msra.mxu1 %v2201_v6  ;;  %v2238_v54 = vsel %vm305_vm1, %v2160_v30, %v2162_v32 }
 0x534   : > { %2390 = vmatmul.mubr.f32.vlgmr.msra.gmra.mxu1 %v1481_v47  ;;  %2661 = vmatprep.subr.mxu1 %v2240_v36 }
 0x535   : > { %2440 = vmatprep.subr.mxu0 %v2238_v54  ;;  %2665 = vmatpush1.msra.mxu1 %v2239_v8 }
 0x536   : > { %2662 = vmatprep.subr.mxu1 %v2238_v54  ;;  %v2158_v7 = vpop.permute.xlu0 %2157  ;;  %2395 = vmatprep.mubr.f32.mxu1 %v1485_v62 }
 0x537   : > { %v2237_v25 = vsel %vm305_vm1, %v2158_v7, %v2160_v30  ;;  %v2152_v57 = vpop.permute.xlu1 %2151 }
 0x538   : > { %2396 = vmatmul.mubr.f32.gmra.mxu1 %v1484_v23  ;;  %2441 = vmatpush1.msra.mxu0 %v2237_v25  ;;  %v2235_v63 = vsel %vm305_vm1, %v2152_v57, %v2154_v41 }
 0x539   : > { %2666 = vmatpush1.msra.mxu1 %v2237_v25  ;;  %2401 = vmatprep.mubr.f32.mxu1 %v1488_v61 }
 0x53a   : > { %v2156_v45 = vpop.permute.xlu0 %2155 }
 0x53b   : > { %v2236_v37 = vsel %vm305_vm1, %v2154_v41, %v2156_v45  ;;  %v2150_v3 = vpop.permute.xlu1 %2149 }
 0x53c   : > { %2402 = vmatmul.mubr.f32.gmra.mxu1 %v1487_v35  ;;  %2442 = vmatprep.subr.mxu0 %v2236_v37 }
 0x53d   : > { %2663 = vmatprep.subr.mxu1 %v2236_v37  ;;  %2443 = vmatpush1.msra.mxu0 %v2235_v63 }
 0x53e   : > { %2667 = vmatpush1.msra.mxu1 %v2235_v63  ;;  %v2148_v0 = vpop.permute.xlu0 %2147  ;;  %2407 = vmatprep.mubr.f32.mxu1 %v1491_v51 }
 0x53f   : > { %v2234_v39 = vsel %vm305_vm1, %v2148_v0, %v2150_v3 }
 0x540   : > { %2408 = vmatmul.mubr.f32.gmra.mxu1 %v1490_v24  ;;  %2444 = vmatprep.subr.mxu0 %v2234_v39 }
 0x541   : > { %2664 = vmatprep.subr.mxu1 %v2234_v39  ;;  %2496 = vmatprep.mubr.f32.mxu1 %v5126_v2 }
 0x542   : > { %v2146_v48 = vpop.permute.xlu0 %2145 }
 0x543   : > { %v2233_v56 = vsel %vm305_vm1, %v2146_v48, %v2148_v0 }
 0x544   : > { %2445 = vmatpush1.msra.mxu0 %v2233_v56  ;;  %2668 = vmatpush1.msra.mxu1 %v2233_v56 }
 0x545   : > { %2650 = vmatmul.mubr.msk.f32.vlgmr.msra.gmra.mxu0 %vm1258_vm13, %v1483_v27  ;;  %2653 = vmatmul.mubr.msk.f32.vlgmr.msra.gmra.mxu1 %vm1258_vm13, %v1492_v18 }
 0x546   : > { %2484 = vmatprep.mubr.f32.mxu0 %v5126_v2 }
 0x548   : > { %v1924_v19 = vpop.permute.xlu1 %1923 }
 0x549   : > { %2651 = vmatmul.mubr.msk.f32.gmra.mxu0 %vm1258_vm13, %v1486_v1 }
 0x54a   : > { %2490 = vmatprep.mubr.f32.mxu0 %v5126_v2 }
 0x54c   : > { %v1934_v12 = vpop.permute.xlu1 %1933 }
 0x54d   : > { %2652 = vmatmul.mubr.msk.f32.gmra.mxu0 %vm1258_vm13, %v1489_v52 }
 0x54f   : > { %v1929_v9 = vpop.permute.xlu0 %1928 }
 0x553   : > { %v1939_v28 = vpop.permute.xlu0 %1938 }
 0x5f4   : > { %v2391_v43 = vpop.f32.mrf.mxu1 }
 0x5f5   : > { %v2392_v16 = vadd.f32 %v2391_v43, %v1924_v19 }
 0x5f6   : > { %v2393_v40 = vpop.f32.mrf.mxu1 }
 0x5f7   : > { %v2394_v14 = vadd.f32 %v2393_v40, %v1924_v19 }
 0x5f8   : > { %v2397_v44 = vpop.f32.mrf.mxu1 }
 0x5f9   : > { %v2398_v58 = vadd.f32 %v2397_v44, %v1929_v9 }
 0x5fa   : > { %v2399_v53 = vpop.f32.mrf.mxu1 }
 0x5fb   : > { %v2400_v46 = vadd.f32 %v2399_v53, %v1929_v9 }
 0x5fc   : > { %v2403_v60 = vpop.f32.mrf.mxu1 }
 0x5fd   : > { %v2404_v8 = vadd.f32 %v2403_v60, %v1934_v12 }
 0x5fe   : > { %v2405_v20 = vpop.f32.mrf.mxu1 }
 0x5ff   : > { %v2406_v54 = vadd.f32 %v2405_v20, %v1934_v12 }
 0x600   : > { %v2409_v13 = vpop.f32.mrf.mxu1 }
 0x601   : > { %v2410_v11 = vadd.f32 %v2409_v13, %v1939_v28 }
 0x602   : > { %v2411_v59 = vpop.f32.mrf.mxu1 }
 0x603   : > { %v2412_v22 = vadd.f32 %v2411_v59, %v1939_v28 }
 0x605   : > { %v2480_v50 = vpop.f32.mrf.mxu0  ;;  %v2498_v34 = vpop.f32.mrf.mxu1 }
 0x606   : > { %v2481_v31 = vadd.f32 %v2480_v50, %v2392_v16  ;;  %v2499_v10 = vadd.f32 %v2498_v34, %v2410_v11 }
 0x607   : > { %v2482_v55 = vpop.f32.mrf.mxu0  ;;  %v2500_v29 = vpop.f32.mrf.mxu1 }
 0x608   : > { %v2503_v49 = vmul.f32 0.2, %v2481_v31  ;;  %v2509_v38 = vmul.f32 0.2, %v2499_v10  ;;  %v2483_v33 = vadd.f32 %v2482_v55, %v2394_v14  ;;  %v2501_v26 = vadd.f32 %v2500_v29, %v2412_v22 }
 0x609   : > { %v2486_v5 = vpop.f32.mrf.mxu0 }
 0x60a   : > { %v2511_v42 = vmax.f32 %v2481_v31, %v2503_v49  ;;  %v2517_v4 = vmax.f32 %v2499_v10, %v2509_v38  ;;  %v2504_v17 = vmul.f32 0.2, %v2483_v33  ;;  %v2510_v32 = vmul.f32 0.2, %v2501_v26 }
 0x60b   : > { %v2487_v36 = vadd.f32 %v2486_v5, %v2398_v58  ;;  %v2488_v21 = vpop.f32.mrf.mxu0 }
 0x60c   : > { %2519 = vst [vmem:[%s298_s17] sm:$0xff] %v2511_v42  ;;  %2525 = vst [vmem:[%s298_s17 + $0x30] sm:$0xff] %v2517_v4  ;;  %v2512_v15 = vmax.f32 %v2483_v33, %v2504_v17  ;;  %v2518_v47 = vmax.f32 %v2501_v26, %v2510_v32  ;;  %v2489_v6 = vadd.f32 %v2488_v21, %v2400_v46 }
 0x60d   : > { %v2505_v30 = vmul.f32 0.2, %v2487_v36  ;;  %v2492_v41 = vpop.f32.mrf.mxu0 }
 0x60e   : > { %2520 = vst [vmem:[%s298_s17 + $0x8] sm:$0xff] %v2512_v15  ;;  %2526 = vst [vmem:[%s298_s17 + $0x38] sm:$0xff] %v2518_v47  ;;  %v2506_v62 = vmul.f32 0.2, %v2489_v6  ;;  %v2493_v23 = vadd.f32 %v2492_v41, %v2404_v8 }
 0x60f   : > { %v2513_v7 = vmax.f32 %v2487_v36, %v2505_v30  ;;  %v2494_v61 = vpop.f32.mrf.mxu0 }
 0x610   : > { %v2514_v25 = vmax.f32 %v2489_v6, %v2506_v62  ;;  %v2507_v57 = vmul.f32 0.2, %v2493_v23  ;;  %v2495_v35 = vadd.f32 %v2494_v61, %v2406_v54 }
 0x611   : > { %2521 = vst [vmem:[%s298_s17 + $0x10] sm:$0xff] %v2513_v7 }
 0x612   : > { %2522 = vst [vmem:[%s298_s17 + $0x18] sm:$0xff] %v2514_v25  ;;  %v2515_v45 = vmax.f32 %v2493_v23, %v2507_v57  ;;  %v2508_v37 = vmul.f32 0.2, %v2495_v35 }
 0x614   : > { %2523 = vst [vmem:[%s298_s17 + $0x20] sm:$0xff] %v2515_v45  ;;  %v2516_v51 = vmax.f32 %v2495_v35, %v2508_v37 }
 0x616   : > { %2524 = vst [vmem:[%s298_s17 + $0x28] sm:$0xff] %v2516_v51 }
 0x617   : > { %2851 = shalt.err (!%p2848_p9)
}
 0x618   : > { %s2852_s11 = scalar_lea.hbm %s4972_s15, 1024  ;;  %s2856_s14 = scalar_lea.hbm %s5021_s6, 2048 }
 0x619   : > { %p2853_p13 = scmp.ne.s32.totalorder %s4972_s15, %s2852_s11  ;;  %p2857_p4 = scmp.lt.s32.totalorder %s4972_s15, %s5021_s6 }
 0x61a   : > { %p2858_p8 = scmp.lt.s32.totalorder %s2856_s14, %s2852_s11 }
 0x61b   : > { %p2854_p5 = pnand %p2853_p13, %p5128_p10 }
 0x61c   : > { %p2859_p3 = por %p2858_p8, %p2857_p4 }
 0x61d   : > { %p2855_p0 = pneg %p2854_p5 }
 0x61f   : > { %p2860_p11 = pnand %p2859_p3, %p2855_p0 }
 0x621   : > { %2863 = shalt.err (!%p2860_p11)
}
 0x622   : > { %s2930_s13 = smov 256   ;;  %s2931_s10 = smov 16  }
 0x623   : > { %2679 = dma.vmem_to_hbm [thread:$0]  (%p5128_p10), %s4967_s12, 1024, %s4972_s15, %s2528_s16, %s2930_s13, %s2930_s13, %s2931_s10  }
 0x624 PF: > { %s2556_s20 = sand.u32 1, %s2894_s21   ;;  %p5129_p1 = scmp.ne.s32.totalorder %s5066_s28, 0 }
 0x625   : > { %p5130_p2 = scmp.ge.s32.totalorder %s2906_s24, 2  ;;  %s2557_s25 = scalar_lea.sflag [#allocation6], %s2556_s20 }
 0x627   : > { %p2693_p6 = pnand %p5130_p2, %p5129_p1 }
 0x629   : > { %p2694_p12 = pneg %p2693_p6 }
 0x62b   : > { %2889 = dma.done.wait (%p2694_p12), %s2557_s25, 1024  }
 0x62c   : > { %2891 = vsyncadd (%p2694_p12), %s2557_s25, 4294966272  ;;  %p20_p7 = scmp.ge.s32.totalorder %s3039_s19, 4   ;;  %s5131_s21 = smov %s2898_s22 }
 0x62d   : > { %s5132_s22 = smov %s2902_s23  ;;  %s5133_s23 = smov %s3055_s7 }
 0x62e   : > { %s5134_s24 = smov %s3039_s19  ;;  %22 = sbr.rel (!%p20_p7) target bundleno = 6 (0x6), region = 97 }
 0x633   :  { %2562 = vsyncpa [#allocation5], 1 }
 0x634   :  { %2564 = vsyncpa [#allocation5 + $0x1], 1 }
 0x635   :  { %2565 = vsyncpa [#allocation8], 1 }
 0x636   :  { %2566 = vsyncpa [#allocation6], 1 }
 0x637   :  { %2568 = vsyncpa [#allocation6 + $0x1], 1 }

</bundles_post_ra>
